<compile_context>
chip_gen: v6e
topology: v6e:2x2x1
jax: 0.10.0
libtpu: 0.0.40
codegen_flags: <defaults>
</compile_context>

<pallas_src>
import jax
import jax.numpy as jnp
from jax import lax
from jax.experimental import pallas as pl
from jax.experimental.pallas import tpu as pltpu

# --- module hyperparameters (fixed by the PyTorch source) ---
n_embd = 384
head_size = 64
num_heads = 6
dropout = 0.2  # unused (eval mode)

_NEG_BIG = -1.0e30  # finite mask value (safe: every causal row has >= 1 valid column)


def mha_kernel(x_ref, wqkv_ref, wp_ref, bp_ref, o_ref):
    """One grid step == one batch element.

    x_ref    : (1, T, C)   bf16  VMEM
    wqkv_ref : (C, 3*C)    bf16  VMEM  columns = [Q_heads | K_heads | V_heads], scale in Q
    wp_ref   : (C, C)      bf16  VMEM  (y = heads_concat @ Wp)
    bp_ref   : (1, C)      f32   VMEM
    o_ref    : (1, T, C)   f32   VMEM
    """
    x = x_ref[0]                      # (T, C) bf16
    T = x.shape[0]

    # Fused QKV projection: one lane-dense matmul, N = 3*C = 1152.
    qkv = jnp.dot(x, wqkv_ref[...], preferred_element_type=jnp.float32)   # (T, 3C) f32

    # Causal mask (built once, reused by every head): keep col <= row.
    row = lax.broadcasted_iota(jnp.int32, (T, T), 0)
    col = lax.broadcasted_iota(jnp.int32, (T, T), 1)
    causal = row >= col

    # Accumulator for the output projection, initialized with the projection bias.
    acc = jnp.broadcast_to(bp_ref[0], (T, n_embd)).astype(jnp.float32)    # (T, C) f32

    for h in range(num_heads):        # static unroll over heads (6)
        q = qkv[:, h * head_size:(h + 1) * head_size].astype(jnp.bfloat16)            # (T, hs), pre-scaled
        k = qkv[:, n_embd + h * head_size: n_embd + (h + 1) * head_size].astype(jnp.bfloat16)
        v = qkv[:, 2 * n_embd + h * head_size: 2 * n_embd + (h + 1) * head_size].astype(jnp.bfloat16)

        # q @ k^T without an explicit transpose: contract the last axis of both operands.
        wei = lax.dot_general(q, k, dimension_numbers=(((1,), (1,)), ((), ())),
                              preferred_element_type=jnp.float32)                     # (T, T) f32
        wei = jnp.where(causal, wei, _NEG_BIG)

        # Numerically stable softmax; the normalizing divide is deferred past P @ V.
        m = jnp.max(wei, axis=-1, keepdims=True)
        e = jnp.exp(wei - m)                                                           # (T, T) f32
        s = jnp.sum(e, axis=-1, keepdims=True)                                         # (T, 1) f32

        o_h = jnp.dot(e.astype(jnp.bfloat16), v,
                      preferred_element_type=jnp.float32)                              # (T, hs), unnormalized
        o_h = o_h * pl.reciprocal(s, approx=True)                                      # EUP reciprocal (free slot)

        # acc += o_h @ Wp[h*hs:(h+1)*hs, :]   (static, sublane-aligned ref slice)
        acc = acc + jnp.dot(o_h.astype(jnp.bfloat16),
                            wp_ref[h * head_size:(h + 1) * head_size, :],
                            preferred_element_type=jnp.float32)                        # (T, C) f32

    o_ref[0] = acc                    # single unmasked lane-dense store


def multi_head_attention(x, wq, wk, wv, wp, bp):
    """x: (B, T, C) f32.  wq/wk/wv: (H, C, head_size).  wp: (C, C).  bp: (1, C).
    Returns (B, T, C) f32."""
    B, T, C = x.shape
    assert C == n_embd
    H, hs = num_heads, head_size
    scale = hs ** -0.5

    # Host-side weight prep (one-time, free relative to the kernel):
    #   * fold the attention scale into the query weights,
    #   * fuse Q/K/V into one (C, 3C) matrix, heads concatenated along columns,
    #   * cast matmul operands to bf16 (halves weight/x DMA bytes, MXU-native dtype).
    wq_cat = (wq * scale).transpose(1, 0, 2).reshape(C, H * hs)
    wk_cat = wk.transpose(1, 0, 2).reshape(C, H * hs)
    wv_cat = wv.transpose(1, 0, 2).reshape(C, H * hs)
    wqkv = jnp.concatenate([wq_cat, wk_cat, wv_cat], axis=-1).astype(jnp.bfloat16)  # (C, 3C)
    wp_bf = wp.astype(jnp.bfloat16)
    x_bf = x.astype(jnp.bfloat16)
    bp_f32 = bp.astype(jnp.float32)

    return pl.pallas_call(
        mha_kernel,
        out_shape=jax.ShapeDtypeStruct((B, T, C), jnp.float32),
        grid=(B,),
        in_specs=[
            pl.BlockSpec((1, T, C), lambda b: (b, 0, 0)),       # x (bf16), per-batch tile
            pl.BlockSpec((C, 3 * C), lambda b: (0, 0)),         # wqkv (bf16, resident across grid)
            pl.BlockSpec((C, C), lambda b: (0, 0)),             # wp (bf16, resident across grid)
            pl.BlockSpec((1, C), lambda b: (0, 0)),             # bp (f32, resident across grid)
        ],
        out_specs=pl.BlockSpec((1, T, C), lambda b: (b, 0, 0)),
        compiler_params=pltpu.CompilerParams(
            dimension_semantics=("parallel",)),                 # batch axis shards across TCs (v7x)
    )(x_bf, wqkv, wp_bf, bp_f32)


def reference(x, wq, wk, wv, wp, bp):
    """Plain-JAX f32 reference matching the PyTorch forward (eval mode)."""
    B, T, C = x.shape
    scale = head_size ** -0.5
    causal = jnp.tril(jnp.ones((T, T))) != 0
    heads = []
    for h in range(num_heads):
        q = x @ wq[h]
        k = x @ wk[h]
        v = x @ wv[h]
        wei = (q @ jnp.swapaxes(k, -2, -1)) * scale
        wei = jnp.where(causal[None], wei, -jnp.inf)
        wei = jax.nn.softmax(wei, axis=-1)
        heads.append(wei @ v)
    cat = jnp.concatenate(heads, axis=-1)
    return cat @ wp + bp[0]


if __name__ == "__main__":
    key = jax.random.PRNGKey(0)
    kx, kq, kk, kv, kp, kb = jax.random.split(key, 6)

    B, T = 2, 8   # small sequence; channel dim fixed at n_embd=384 by the module
    x = jax.random.normal(kx, (B, T, n_embd), dtype=jnp.float32)

    # deterministic "weights" (shapes from the nn.Linear defs; pre-transposed to (in, out))
    wq = jax.random.normal(kq, (num_heads, n_embd, head_size), jnp.float32) * 0.02
    wk = jax.random.normal(kk, (num_heads, n_embd, head_size), jnp.float32) * 0.02
    wv = jax.random.normal(kv, (num_heads, n_embd, head_size), jnp.float32) * 0.02
    wp = jax.random.normal(kp, (n_embd, n_embd), jnp.float32) * 0.02
    bp = jax.random.normal(kb, (1, n_embd), jnp.float32) * 0.02

    out = multi_head_attention(x, wq, wk, wv, wp, bp)
    out = jax.block_until_ready(out)

    ref = reference(x, wq, wk, wv, wp, bp)
    assert out.shape == (B, T, n_embd)
    # bf16 matmul operands + approximate EUP reciprocal -> loosened tolerance vs f32 reference
    assert jnp.allclose(out, ref, atol=2e-2, rtol=2e-2), "mismatch vs reference"

    print("KERNEL_OK")
</pallas_src>

<mosaic_0001>
module attributes {stable_mosaic.version = 11 : i64} {
  func.func @mha_kernel(%arg0: i32, %arg1: memref<1x8x384xbf16, #tpu.memory_space<vmem>>, %arg2: memref<384x1152xbf16, #tpu.memory_space<vmem>>, %arg3: memref<384x384xbf16, #tpu.memory_space<vmem>>, %arg4: memref<1x384xf32, #tpu.memory_space<vmem>>, %arg5: memref<1x8x384xf32, #tpu.memory_space<vmem>>) attributes {dimension_semantics = [#tpu.dimension_semantics<parallel>], iteration_bounds = array<i64: 2>, scalar_prefetch = 0 : i64, scratch_operands = 0 : i64, tpu.core_type = #tpu.core_type<tc>, window_params = [{transform_indices = @transform_0, window_bounds = array<i64: 1, 8, 384>}, {pipeline_mode = #tpu.pipeline_mode<synchronous>, transform_indices = @transform_1, window_bounds = array<i64: 384, 1152>}, {pipeline_mode = #tpu.pipeline_mode<synchronous>, transform_indices = @transform_2, window_bounds = array<i64: 384, 384>}, {pipeline_mode = #tpu.pipeline_mode<synchronous>, transform_indices = @transform_3, window_bounds = array<i64: 1, 384>}, {transform_indices = @transform_4, window_bounds = array<i64: 1, 8, 384>}]} {
    %c0 = arith.constant 0 : index
    %c0_0 = arith.constant 0 : index
    %c0_1 = arith.constant 0 : index
    %0 = vector.load %arg1[%c0, %c0_0, %c0_1] : memref<1x8x384xbf16, #tpu.memory_space<vmem>>, vector<1x8x384xbf16>
    %1 = vector.shape_cast %0 : vector<1x8x384xbf16> to vector<8x384xbf16>
    %c0_2 = arith.constant 0 : index
    %c0_3 = arith.constant 0 : index
    %2 = vector.load %arg2[%c0_2, %c0_3] : memref<384x1152xbf16, #tpu.memory_space<vmem>>, vector<384x1152xbf16>
    %cst = arith.constant dense<0.000000e+00> : vector<8x1152xf32>
    %3 = tpu.matmul %1, %2, %cst {dimension_numbers = #tpu.dot_dimension_numbers<[1], [0], [0], [1], [0, 0, 1, 1], [], []>} : vector<8x384xbf16>, vector<384x1152xbf16>, vector<8x1152xf32> -> vector<8x1152xf32>
    %4 = tpu.iota {dimensions = array<i32: 0>} : vector<8x8xi32>
    %5 = tpu.iota {dimensions = array<i32: 1>} : vector<8x8xi32>
    %6 = arith.cmpi sge, %4, %5 : vector<8x8xi32>
    %c0_4 = arith.constant 0 : index
    %c0_5 = arith.constant 0 : index
    %7 = vector.load %arg4[%c0_4, %c0_5] : memref<1x384xf32, #tpu.memory_space<vmem>>, vector<1x384xf32>
    %8 = vector.shape_cast %7 : vector<1x384xf32> to vector<384xf32>
    %9 = vector.shape_cast %8 : vector<384xf32> to vector<1x384xf32>
    %10 = vector.broadcast %9 : vector<1x384xf32> to vector<8x384xf32>
    %11 = vector.extract_strided_slice %3 {offsets = [0, 0], sizes = [8, 64], strides = [1, 1]} : vector<8x1152xf32> to vector<8x64xf32>
    %12 = arith.truncf %11 : vector<8x64xf32> to vector<8x64xbf16>
    %13 = vector.extract_strided_slice %3 {offsets = [0, 384], sizes = [8, 64], strides = [1, 1]} : vector<8x1152xf32> to vector<8x64xf32>
    %14 = arith.truncf %13 : vector<8x64xf32> to vector<8x64xbf16>
    %15 = vector.extract_strided_slice %3 {offsets = [0, 768], sizes = [8, 64], strides = [1, 1]} : vector<8x1152xf32> to vector<8x64xf32>
    %16 = arith.truncf %15 : vector<8x64xf32> to vector<8x64xbf16>
    %cst_6 = arith.constant dense<0.000000e+00> : vector<8x8xf32>
    %17 = tpu.matmul %12, %14, %cst_6 {dimension_numbers = #tpu.dot_dimension_numbers<[1], [1], [0], [0], [0, 0, 1, 0], [], []>} : vector<8x64xbf16>, vector<8x64xbf16>, vector<8x8xf32> -> vector<8x8xf32>
    %cst_7 = arith.constant -1.000000e+30 : f32
    %18 = vector.broadcast %cst_7 : f32 to vector<8x8xf32>
    %19 = arith.select %6, %17, %18 : vector<8x8xi1>, vector<8x8xf32>
    %cst_8 = arith.constant dense<0xFF800000> : vector<8xf32>
    %20 = vector.multi_reduction <maximumf>, %19, %cst_8 [1] : vector<8x8xf32> to vector<8xf32>
    %21 = vector.shape_cast %20 : vector<8xf32> to vector<8x1xf32>
    %22 = vector.broadcast %21 : vector<8x1xf32> to vector<8x8xf32>
    %23 = arith.subf %19, %22 : vector<8x8xf32>
    %24 = math.exp %23 : vector<8x8xf32>
    %cst_9 = arith.constant dense<0.000000e+00> : vector<8xf32>
    %25 = vector.multi_reduction <add>, %24, %cst_9 [1] : vector<8x8xf32> to vector<8xf32>
    %26 = vector.shape_cast %25 : vector<8xf32> to vector<8x1xf32>
    %27 = arith.truncf %24 : vector<8x8xf32> to vector<8x8xbf16>
    %cst_10 = arith.constant dense<0.000000e+00> : vector<8x64xf32>
    %28 = tpu.matmul %27, %16, %cst_10 {dimension_numbers = #tpu.dot_dimension_numbers<[1], [0], [0], [1], [0, 0, 1, 1], [], []>} : vector<8x8xbf16>, vector<8x64xbf16>, vector<8x64xf32> -> vector<8x64xf32>
    %29 = tpu.reciprocal %26 {approx = true} : vector<8x1xf32> -> vector<8x1xf32>
    %30 = vector.broadcast %29 : vector<8x1xf32> to vector<8x64xf32>
    %31 = arith.mulf %28, %30 : vector<8x64xf32>
    %32 = arith.truncf %31 : vector<8x64xf32> to vector<8x64xbf16>
    %c0_11 = arith.constant 0 : index
    %c0_12 = arith.constant 0 : index
    %33 = vector.load %arg3[%c0_11, %c0_12] : memref<384x384xbf16, #tpu.memory_space<vmem>>, vector<64x384xbf16>
    %cst_13 = arith.constant dense<0.000000e+00> : vector<8x384xf32>
    %34 = tpu.matmul %32, %33, %cst_13 {dimension_numbers = #tpu.dot_dimension_numbers<[1], [0], [0], [1], [0, 0, 1, 1], [], []>} : vector<8x64xbf16>, vector<64x384xbf16>, vector<8x384xf32> -> vector<8x384xf32>
    %35 = arith.addf %10, %34 : vector<8x384xf32>
    %36 = vector.extract_strided_slice %3 {offsets = [0, 64], sizes = [8, 64], strides = [1, 1]} : vector<8x1152xf32> to vector<8x64xf32>
    %37 = arith.truncf %36 : vector<8x64xf32> to vector<8x64xbf16>
    %38 = vector.extract_strided_slice %3 {offsets = [0, 448], sizes = [8, 64], strides = [1, 1]} : vector<8x1152xf32> to vector<8x64xf32>
    %39 = arith.truncf %38 : vector<8x64xf32> to vector<8x64xbf16>
    %40 = vector.extract_strided_slice %3 {offsets = [0, 832], sizes = [8, 64], strides = [1, 1]} : vector<8x1152xf32> to vector<8x64xf32>
    %41 = arith.truncf %40 : vector<8x64xf32> to vector<8x64xbf16>
    %cst_14 = arith.constant dense<0.000000e+00> : vector<8x8xf32>
    %42 = tpu.matmul %37, %39, %cst_14 {dimension_numbers = #tpu.dot_dimension_numbers<[1], [1], [0], [0], [0, 0, 1, 0], [], []>} : vector<8x64xbf16>, vector<8x64xbf16>, vector<8x8xf32> -> vector<8x8xf32>
    %cst_15 = arith.constant -1.000000e+30 : f32
    %43 = vector.broadcast %cst_15 : f32 to vector<8x8xf32>
    %44 = arith.select %6, %42, %43 : vector<8x8xi1>, vector<8x8xf32>
    %cst_16 = arith.constant dense<0xFF800000> : vector<8xf32>
    %45 = vector.multi_reduction <maximumf>, %44, %cst_16 [1] : vector<8x8xf32> to vector<8xf32>
    %46 = vector.shape_cast %45 : vector<8xf32> to vector<8x1xf32>
    %47 = vector.broadcast %46 : vector<8x1xf32> to vector<8x8xf32>
    %48 = arith.subf %44, %47 : vector<8x8xf32>
    %49 = math.exp %48 : vector<8x8xf32>
    %cst_17 = arith.constant dense<0.000000e+00> : vector<8xf32>
    %50 = vector.multi_reduction <add>, %49, %cst_17 [1] : vector<8x8xf32> to vector<8xf32>
    %51 = vector.shape_cast %50 : vector<8xf32> to vector<8x1xf32>
    %52 = arith.truncf %49 : vector<8x8xf32> to vector<8x8xbf16>
    %cst_18 = arith.constant dense<0.000000e+00> : vector<8x64xf32>
    %53 = tpu.matmul %52, %41, %cst_18 {dimension_numbers = #tpu.dot_dimension_numbers<[1], [0], [0], [1], [0, 0, 1, 1], [], []>} : vector<8x8xbf16>, vector<8x64xbf16>, vector<8x64xf32> -> vector<8x64xf32>
    %54 = tpu.reciprocal %51 {approx = true} : vector<8x1xf32> -> vector<8x1xf32>
    %55 = vector.broadcast %54 : vector<8x1xf32> to vector<8x64xf32>
    %56 = arith.mulf %53, %55 : vector<8x64xf32>
    %57 = arith.truncf %56 : vector<8x64xf32> to vector<8x64xbf16>
    %c64 = arith.constant 64 : index
    %c0_19 = arith.constant 0 : index
    %58 = vector.load %arg3[%c64, %c0_19] : memref<384x384xbf16, #tpu.memory_space<vmem>>, vector<64x384xbf16>
    %cst_20 = arith.constant dense<0.000000e+00> : vector<8x384xf32>
    %59 = tpu.matmul %57, %58, %cst_20 {dimension_numbers = #tpu.dot_dimension_numbers<[1], [0], [0], [1], [0, 0, 1, 1], [], []>} : vector<8x64xbf16>, vector<64x384xbf16>, vector<8x384xf32> -> vector<8x384xf32>
    %60 = arith.addf %35, %59 : vector<8x384xf32>
    %61 = vector.extract_strided_slice %3 {offsets = [0, 128], sizes = [8, 64], strides = [1, 1]} : vector<8x1152xf32> to vector<8x64xf32>
    %62 = arith.truncf %61 : vector<8x64xf32> to vector<8x64xbf16>
    %63 = vector.extract_strided_slice %3 {offsets = [0, 512], sizes = [8, 64], strides = [1, 1]} : vector<8x1152xf32> to vector<8x64xf32>
    %64 = arith.truncf %63 : vector<8x64xf32> to vector<8x64xbf16>
    %65 = vector.extract_strided_slice %3 {offsets = [0, 896], sizes = [8, 64], strides = [1, 1]} : vector<8x1152xf32> to vector<8x64xf32>
    %66 = arith.truncf %65 : vector<8x64xf32> to vector<8x64xbf16>
    %cst_21 = arith.constant dense<0.000000e+00> : vector<8x8xf32>
    %67 = tpu.matmul %62, %64, %cst_21 {dimension_numbers = #tpu.dot_dimension_numbers<[1], [1], [0], [0], [0, 0, 1, 0], [], []>} : vector<8x64xbf16>, vector<8x64xbf16>, vector<8x8xf32> -> vector<8x8xf32>
    %cst_22 = arith.constant -1.000000e+30 : f32
    %68 = vector.broadcast %cst_22 : f32 to vector<8x8xf32>
    %69 = arith.select %6, %67, %68 : vector<8x8xi1>, vector<8x8xf32>
    %cst_23 = arith.constant dense<0xFF800000> : vector<8xf32>
    %70 = vector.multi_reduction <maximumf>, %69, %cst_23 [1] : vector<8x8xf32> to vector<8xf32>
    %71 = vector.shape_cast %70 : vector<8xf32> to vector<8x1xf32>
    %72 = vector.broadcast %71 : vector<8x1xf32> to vector<8x8xf32>
    %73 = arith.subf %69, %72 : vector<8x8xf32>
    %74 = math.exp %73 : vector<8x8xf32>
    %cst_24 = arith.constant dense<0.000000e+00> : vector<8xf32>
    %75 = vector.multi_reduction <add>, %74, %cst_24 [1] : vector<8x8xf32> to vector<8xf32>
    %76 = vector.shape_cast %75 : vector<8xf32> to vector<8x1xf32>
    %77 = arith.truncf %74 : vector<8x8xf32> to vector<8x8xbf16>
    %cst_25 = arith.constant dense<0.000000e+00> : vector<8x64xf32>
    %78 = tpu.matmul %77, %66, %cst_25 {dimension_numbers = #tpu.dot_dimension_numbers<[1], [0], [0], [1], [0, 0, 1, 1], [], []>} : vector<8x8xbf16>, vector<8x64xbf16>, vector<8x64xf32> -> vector<8x64xf32>
    %79 = tpu.reciprocal %76 {approx = true} : vector<8x1xf32> -> vector<8x1xf32>
    %80 = vector.broadcast %79 : vector<8x1xf32> to vector<8x64xf32>
    %81 = arith.mulf %78, %80 : vector<8x64xf32>
    %82 = arith.truncf %81 : vector<8x64xf32> to vector<8x64xbf16>
    %c128 = arith.constant 128 : index
    %c0_26 = arith.constant 0 : index
    %83 = vector.load %arg3[%c128, %c0_26] : memref<384x384xbf16, #tpu.memory_space<vmem>>, vector<64x384xbf16>
    %cst_27 = arith.constant dense<0.000000e+00> : vector<8x384xf32>
    %84 = tpu.matmul %82, %83, %cst_27 {dimension_numbers = #tpu.dot_dimension_numbers<[1], [0], [0], [1], [0, 0, 1, 1], [], []>} : vector<8x64xbf16>, vector<64x384xbf16>, vector<8x384xf32> -> vector<8x384xf32>
    %85 = arith.addf %60, %84 : vector<8x384xf32>
    %86 = vector.extract_strided_slice %3 {offsets = [0, 192], sizes = [8, 64], strides = [1, 1]} : vector<8x1152xf32> to vector<8x64xf32>
    %87 = arith.truncf %86 : vector<8x64xf32> to vector<8x64xbf16>
    %88 = vector.extract_strided_slice %3 {offsets = [0, 576], sizes = [8, 64], strides = [1, 1]} : vector<8x1152xf32> to vector<8x64xf32>
    %89 = arith.truncf %88 : vector<8x64xf32> to vector<8x64xbf16>
    %90 = vector.extract_strided_slice %3 {offsets = [0, 960], sizes = [8, 64], strides = [1, 1]} : vector<8x1152xf32> to vector<8x64xf32>
    %91 = arith.truncf %90 : vector<8x64xf32> to vector<8x64xbf16>
    %cst_28 = arith.constant dense<0.000000e+00> : vector<8x8xf32>
    %92 = tpu.matmul %87, %89, %cst_28 {dimension_numbers = #tpu.dot_dimension_numbers<[1], [1], [0], [0], [0, 0, 1, 0], [], []>} : vector<8x64xbf16>, vector<8x64xbf16>, vector<8x8xf32> -> vector<8x8xf32>
    %cst_29 = arith.constant -1.000000e+30 : f32
    %93 = vector.broadcast %cst_29 : f32 to vector<8x8xf32>
    %94 = arith.select %6, %92, %93 : vector<8x8xi1>, vector<8x8xf32>
    %cst_30 = arith.constant dense<0xFF800000> : vector<8xf32>
    %95 = vector.multi_reduction <maximumf>, %94, %cst_30 [1] : vector<8x8xf32> to vector<8xf32>
    %96 = vector.shape_cast %95 : vector<8xf32> to vector<8x1xf32>
    %97 = vector.broadcast %96 : vector<8x1xf32> to vector<8x8xf32>
    %98 = arith.subf %94, %97 : vector<8x8xf32>
    %99 = math.exp %98 : vector<8x8xf32>
    %cst_31 = arith.constant dense<0.000000e+00> : vector<8xf32>
    %100 = vector.multi_reduction <add>, %99, %cst_31 [1] : vector<8x8xf32> to vector<8xf32>
    %101 = vector.shape_cast %100 : vector<8xf32> to vector<8x1xf32>
    %102 = arith.truncf %99 : vector<8x8xf32> to vector<8x8xbf16>
    %cst_32 = arith.constant dense<0.000000e+00> : vector<8x64xf32>
    %103 = tpu.matmul %102, %91, %cst_32 {dimension_numbers = #tpu.dot_dimension_numbers<[1], [0], [0], [1], [0, 0, 1, 1], [], []>} : vector<8x8xbf16>, vector<8x64xbf16>, vector<8x64xf32> -> vector<8x64xf32>
    %104 = tpu.reciprocal %101 {approx = true} : vector<8x1xf32> -> vector<8x1xf32>
    %105 = vector.broadcast %104 : vector<8x1xf32> to vector<8x64xf32>
    %106 = arith.mulf %103, %105 : vector<8x64xf32>
    %107 = arith.truncf %106 : vector<8x64xf32> to vector<8x64xbf16>
    %c192 = arith.constant 192 : index
    %c0_33 = arith.constant 0 : index
    %108 = vector.load %arg3[%c192, %c0_33] : memref<384x384xbf16, #tpu.memory_space<vmem>>, vector<64x384xbf16>
    %cst_34 = arith.constant dense<0.000000e+00> : vector<8x384xf32>
    %109 = tpu.matmul %107, %108, %cst_34 {dimension_numbers = #tpu.dot_dimension_numbers<[1], [0], [0], [1], [0, 0, 1, 1], [], []>} : vector<8x64xbf16>, vector<64x384xbf16>, vector<8x384xf32> -> vector<8x384xf32>
    %110 = arith.addf %85, %109 : vector<8x384xf32>
    %111 = vector.extract_strided_slice %3 {offsets = [0, 256], sizes = [8, 64], strides = [1, 1]} : vector<8x1152xf32> to vector<8x64xf32>
    %112 = arith.truncf %111 : vector<8x64xf32> to vector<8x64xbf16>
    %113 = vector.extract_strided_slice %3 {offsets = [0, 640], sizes = [8, 64], strides = [1, 1]} : vector<8x1152xf32> to vector<8x64xf32>
    %114 = arith.truncf %113 : vector<8x64xf32> to vector<8x64xbf16>
    %115 = vector.extract_strided_slice %3 {offsets = [0, 1024], sizes = [8, 64], strides = [1, 1]} : vector<8x1152xf32> to vector<8x64xf32>
    %116 = arith.truncf %115 : vector<8x64xf32> to vector<8x64xbf16>
    %cst_35 = arith.constant dense<0.000000e+00> : vector<8x8xf32>
    %117 = tpu.matmul %112, %114, %cst_35 {dimension_numbers = #tpu.dot_dimension_numbers<[1], [1], [0], [0], [0, 0, 1, 0], [], []>} : vector<8x64xbf16>, vector<8x64xbf16>, vector<8x8xf32> -> vector<8x8xf32>
    %cst_36 = arith.constant -1.000000e+30 : f32
    %118 = vector.broadcast %cst_36 : f32 to vector<8x8xf32>
    %119 = arith.select %6, %117, %118 : vector<8x8xi1>, vector<8x8xf32>
    %cst_37 = arith.constant dense<0xFF800000> : vector<8xf32>
    %120 = vector.multi_reduction <maximumf>, %119, %cst_37 [1] : vector<8x8xf32> to vector<8xf32>
    %121 = vector.shape_cast %120 : vector<8xf32> to vector<8x1xf32>
    %122 = vector.broadcast %121 : vector<8x1xf32> to vector<8x8xf32>
    %123 = arith.subf %119, %122 : vector<8x8xf32>
    %124 = math.exp %123 : vector<8x8xf32>
    %cst_38 = arith.constant dense<0.000000e+00> : vector<8xf32>
    %125 = vector.multi_reduction <add>, %124, %cst_38 [1] : vector<8x8xf32> to vector<8xf32>
    %126 = vector.shape_cast %125 : vector<8xf32> to vector<8x1xf32>
    %127 = arith.truncf %124 : vector<8x8xf32> to vector<8x8xbf16>
    %cst_39 = arith.constant dense<0.000000e+00> : vector<8x64xf32>
    %128 = tpu.matmul %127, %116, %cst_39 {dimension_numbers = #tpu.dot_dimension_numbers<[1], [0], [0], [1], [0, 0, 1, 1], [], []>} : vector<8x8xbf16>, vector<8x64xbf16>, vector<8x64xf32> -> vector<8x64xf32>
    %129 = tpu.reciprocal %126 {approx = true} : vector<8x1xf32> -> vector<8x1xf32>
    %130 = vector.broadcast %129 : vector<8x1xf32> to vector<8x64xf32>
    %131 = arith.mulf %128, %130 : vector<8x64xf32>
    %132 = arith.truncf %131 : vector<8x64xf32> to vector<8x64xbf16>
    %c256 = arith.constant 256 : index
    %c0_40 = arith.constant 0 : index
    %133 = vector.load %arg3[%c256, %c0_40] : memref<384x384xbf16, #tpu.memory_space<vmem>>, vector<64x384xbf16>
    %cst_41 = arith.constant dense<0.000000e+00> : vector<8x384xf32>
    %134 = tpu.matmul %132, %133, %cst_41 {dimension_numbers = #tpu.dot_dimension_numbers<[1], [0], [0], [1], [0, 0, 1, 1], [], []>} : vector<8x64xbf16>, vector<64x384xbf16>, vector<8x384xf32> -> vector<8x384xf32>
    %135 = arith.addf %110, %134 : vector<8x384xf32>
    %136 = vector.extract_strided_slice %3 {offsets = [0, 320], sizes = [8, 64], strides = [1, 1]} : vector<8x1152xf32> to vector<8x64xf32>
    %137 = arith.truncf %136 : vector<8x64xf32> to vector<8x64xbf16>
    %138 = vector.extract_strided_slice %3 {offsets = [0, 704], sizes = [8, 64], strides = [1, 1]} : vector<8x1152xf32> to vector<8x64xf32>
    %139 = arith.truncf %138 : vector<8x64xf32> to vector<8x64xbf16>
    %140 = vector.extract_strided_slice %3 {offsets = [0, 1088], sizes = [8, 64], strides = [1, 1]} : vector<8x1152xf32> to vector<8x64xf32>
    %141 = arith.truncf %140 : vector<8x64xf32> to vector<8x64xbf16>
    %cst_42 = arith.constant dense<0.000000e+00> : vector<8x8xf32>
    %142 = tpu.matmul %137, %139, %cst_42 {dimension_numbers = #tpu.dot_dimension_numbers<[1], [1], [0], [0], [0, 0, 1, 0], [], []>} : vector<8x64xbf16>, vector<8x64xbf16>, vector<8x8xf32> -> vector<8x8xf32>
    %cst_43 = arith.constant -1.000000e+30 : f32
    %143 = vector.broadcast %cst_43 : f32 to vector<8x8xf32>
    %144 = arith.select %6, %142, %143 : vector<8x8xi1>, vector<8x8xf32>
    %cst_44 = arith.constant dense<0xFF800000> : vector<8xf32>
    %145 = vector.multi_reduction <maximumf>, %144, %cst_44 [1] : vector<8x8xf32> to vector<8xf32>
    %146 = vector.shape_cast %145 : vector<8xf32> to vector<8x1xf32>
    %147 = vector.broadcast %146 : vector<8x1xf32> to vector<8x8xf32>
    %148 = arith.subf %144, %147 : vector<8x8xf32>
    %149 = math.exp %148 : vector<8x8xf32>
    %cst_45 = arith.constant dense<0.000000e+00> : vector<8xf32>
    %150 = vector.multi_reduction <add>, %149, %cst_45 [1] : vector<8x8xf32> to vector<8xf32>
    %151 = vector.shape_cast %150 : vector<8xf32> to vector<8x1xf32>
    %152 = arith.truncf %149 : vector<8x8xf32> to vector<8x8xbf16>
    %cst_46 = arith.constant dense<0.000000e+00> : vector<8x64xf32>
    %153 = tpu.matmul %152, %141, %cst_46 {dimension_numbers = #tpu.dot_dimension_numbers<[1], [0], [0], [1], [0, 0, 1, 1], [], []>} : vector<8x8xbf16>, vector<8x64xbf16>, vector<8x64xf32> -> vector<8x64xf32>
    %154 = tpu.reciprocal %151 {approx = true} : vector<8x1xf32> -> vector<8x1xf32>
    %155 = vector.broadcast %154 : vector<8x1xf32> to vector<8x64xf32>
    %156 = arith.mulf %153, %155 : vector<8x64xf32>
    %157 = arith.truncf %156 : vector<8x64xf32> to vector<8x64xbf16>
    %c320 = arith.constant 320 : index
    %c0_47 = arith.constant 0 : index
    %158 = vector.load %arg3[%c320, %c0_47] : memref<384x384xbf16, #tpu.memory_space<vmem>>, vector<64x384xbf16>
    %cst_48 = arith.constant dense<0.000000e+00> : vector<8x384xf32>
    %159 = tpu.matmul %157, %158, %cst_48 {dimension_numbers = #tpu.dot_dimension_numbers<[1], [0], [0], [1], [0, 0, 1, 1], [], []>} : vector<8x64xbf16>, vector<64x384xbf16>, vector<8x384xf32> -> vector<8x384xf32>
    %160 = arith.addf %135, %159 : vector<8x384xf32>
    %c0_49 = arith.constant 0 : index
    %c0_50 = arith.constant 0 : index
    %c0_51 = arith.constant 0 : index
    %161 = vector.load %arg5[%c0_49, %c0_50, %c0_51] : memref<1x8x384xf32, #tpu.memory_space<vmem>>, vector<1x8x384xf32>
    %162 = vector.shape_cast %161 : vector<1x8x384xf32> to vector<8x384xf32>
    %163 = vector.shape_cast %160 : vector<8x384xf32> to vector<1x8x384xf32>
    tpu.vector_store %arg5[%c0_49, %c0_50, %c0_51], %163 {strides = array<i32>} : memref<1x8x384xf32, #tpu.memory_space<vmem>>, vector<1x8x384xf32>,
    return
  }
  func.func @transform_0(%arg0: i32) -> (i32, i32, i32) {
    %c0_i32 = arith.constant 0 : i32
    %c0_i32_0 = arith.constant 0 : i32
    %c0_i32_1 = arith.constant 0 : i32
    return %arg0, %c0_i32, %c0_i32_0 : i32, i32, i32
  }
  func.func @transform_1(%arg0: i32) -> (i32, i32) {
    %c0_i32 = arith.constant 0 : i32
    %c0_i32_0 = arith.constant 0 : i32
    %c0_i32_1 = arith.constant 0 : i32
    return %c0_i32, %c0_i32_0 : i32, i32
  }
  func.func @transform_2(%arg0: i32) -> (i32, i32) {
    %c0_i32 = arith.constant 0 : i32
    %c0_i32_0 = arith.constant 0 : i32
    %c0_i32_1 = arith.constant 0 : i32
    return %c0_i32, %c0_i32_0 : i32, i32
  }
  func.func @transform_3(%arg0: i32) -> (i32, i32) {
    %c0_i32 = arith.constant 0 : i32
    %c0_i32_0 = arith.constant 0 : i32
    %c0_i32_1 = arith.constant 0 : i32
    return %c0_i32, %c0_i32_0 : i32, i32
  }
  func.func @transform_4(%arg0: i32) -> (i32, i32, i32) {
    %c0_i32 = arith.constant 0 : i32
    %c0_i32_0 = arith.constant 0 : i32
    %c0_i32_1 = arith.constant 0 : i32
    return %arg0, %c0_i32, %c0_i32_0 : i32, i32, i32
  }
}

</mosaic_0001>

<bundles_post_ra>
// kernel: tpu_custom_call.1
= control target key start
LH: loop header
LB: loop body
LE: loop exit
PB: predicated region body
PF: predicated region fallthrough
CT: control target
= control target key end

     0   :  { %9 = vsyncpa [#allocation3], 0  ;;  %s5543_s0 = inlined_call_operand.hbm [shape: bf16[2,8,384], index: 0, kind: input, shape index: {}]   ;;  %s5544_s1 = inlined_call_operand.hbm [shape: bf16[384,1152], index: 1, kind: input, shape index: {}]   ;;  %s5545_s2 = inlined_call_operand.hbm [shape: bf16[384,384], index: 2, kind: input, shape index: {}]   ;;  %s5546_s3 = inlined_call_operand.vmem [shape: f32[1,384], index: 3, kind: input, shape index: {}]   ;;  %s5547_s4 = inlined_call_operand.hbm [shape: f32[2,8,384], index: 4, kind: output, shape index: {}]  }
   0x1   :  { %11 = vsyncpa [#allocation3 + $0x1], 0 }
   0x2   :  { %12 = vsyncpa [#allocation6], 0 }
   0x3   :  { %13 = vsyncpa [#allocation4], 0 }
   0x4   :  { %15 = vsyncpa [#allocation4 + $0x1], 0  ;;  %s5094_s15 = smov 0   ;;  %s5096_s16 = smov 0  }
   0x5   :  { %s5098_s17 = smov 0   ;;  %s5100_s18 = smov 0  }
   0x6 LB: > { %s5115_s19 = sadd.s32 4294967295, %s5055_s18   ;;  %s3815_s20 = sadd.s32 4294967294, %s5055_s18   ;;  %s5055_s18 = sphi %s5100_s18, %s5571_s18   ;;  %s5051_s17 = sphi %s5098_s17, %s5570_s17   ;;  %s5047_s16 = sphi %s5096_s16, %s5569_s16   ;;  %s5043_s15 = sphi %s5094_s15, %s5568_s15  }
   0x7   : > { %p41_p0 = scmp.ne.s32.totalorder %s5047_s16, %s5043_s15  ;;  %p5548_p1 = scmp.eq.s32.totalorder %s5115_s19, 0 }
   0x8   : > { %p134_p3 = scmp.eq.s32.totalorder %s3815_s20, 1  ;;  %p3816_p5 = scmp.ge.s32.totalorder %s5055_s18, 1 }
   0x9   : > { %p5124_p4 = por %p5548_p1, %p41_p0  ;;  %p141_p7 = scmp.lt.s32.totalorder %s5055_s18, 3 }
   0xa   : > { %p5129_p6 = por %p134_p3, %p41_p0  ;;  %s5057_s24 = smov [#allocation5]  }
   0xb   : > { %s5552_s21 = scalar_select %p5124_p4, 1, 0 }
   0xc   : > { %s5553_s22 = scalar_select %p5129_p6, 1, 0 }
   0xd   : > { %p5134_p8 = pnand %p3816_p5, %p141_p7  ;;  %s153_s25 = sshll.u32 %s5057_s24, 4  ;;  %s154_s25 = int_to_ptr.vmem [resolvable:$true] %s153_s25 }
   0xe   : > { %s5058_s27 = smov [#allocation7]   ;;  %s4918_s29 = scalar_lea.vmem %s154_s25, 27648 }
   0xf   : > { %s5554_s23 = scalar_select %p5134_p8, 1, 0 }
  0x10   : > { %p4408_p9 = pneg %p5134_p8  ;;  %s166_s28 = sshll.u32 %s5058_s27, 4  ;;  %s167_s28 = int_to_ptr.vmem [resolvable:$true] %s166_s28 }
  0x11   : > { %p4919_p13 = scmp.ne.s32.totalorder %s154_s25, %s4918_s29  ;;  %p4926_p5 = scmp.lt.s32.totalorder %s154_s25, %s154_s25 }
  0x12   : > { %p5143_p11 = pnand %p4408_p9, %p5548_p1  ;;  %p4927_p7 = scmp.lt.s32.totalorder %s4918_s29, %s4918_s29 }
  0x14   : > { %p4909_p12 = pneg %p5143_p11  ;;  %p4928_p10 = por %p4927_p7, %p4926_p5 }
  0x16   : > { %p4921_p0 = pnand %p4919_p13, %p4909_p12 }
  0x18   : > { %p4922_p3 = pneg %p4921_p0 }
  0x1a   : > { %p4929_p9 = pnand %p4928_p10, %p4922_p3 }
  0x1c   : > { %4932 = shalt.err (!%p4929_p9)
}
  0x1d   : > { %s5059_s30 = smov 576   ;;  %s5060_s5 = smov 36  }
  0x1e   : > { %4411 = dma.hbm_to_vmem [thread:$0]  (!%p5143_p11), %s5544_s1, 27648, %s154_s25, [#allocation6], %s5059_s30, %s5059_s30, %s5060_s5  }
  0x1f   : > { %s4944_s8 = scalar_lea.vmem %s167_s28, 9216  ;;  %p4952_p2 = scmp.lt.s32.totalorder %s167_s28, %s167_s28 }
  0x20   : > { %p4945_p1 = scmp.ne.s32.totalorder %s167_s28, %s4944_s8  ;;  %p4953_p6 = scmp.lt.s32.totalorder %s4944_s8, %s4944_s8 }
  0x22   : > { %p4947_p13 = pnand %p4945_p1, %p4909_p12  ;;  %p4954_p5 = por %p4953_p6, %p4952_p2 }
  0x24   : > { %p4948_p0 = pneg %p4947_p13 }
  0x26   : > { %p4955_p10 = pnand %p4954_p5, %p4948_p0 }
  0x28   : > { %4958 = shalt.err (!%p4955_p10)
}
  0x29   : > { %s5061_s9 = smov 192   ;;  %s5062_s10 = smov 12  }
  0x2a   : > { %4414 = dma.hbm_to_vmem [thread:$0]  (!%p5143_p11), %s5545_s2, 9216, %s167_s28, [#allocation6], %s5061_s9, %s5061_s9, %s5062_s10  }
  0x2b   : > { %s5166_s13 = sadd.s32 1, %s5055_s18   ;;  %s28_s20 = sadd.s32 1, %s5051_s17 }
  0x2c   : > { %s25_s14 = ssub.s32 %s5055_s18, %s5166_s13  ;;  %p35_p2 = scmp.ne.s32.totalorder %s5051_s17, %s5047_s16 }
  0x2d   : > { %p26_p1 = scmp.eq.s32.totalorder %s25_s14, 0  ;;  %p36_p6 = scmp.eq.s32.totalorder %s5055_s18, 0 }
  0x2e   : > { %p5556_p3 = scmp.eq.s32.totalorder %s5115_s19, 1  ;;  %p4425_p9 = scmp.lt.s32.totalorder %s5055_s18, 2 }
  0x2f   : > { %s5175_s24 = scalar_select %p26_p1, %s5051_s17, %s28_s20  }
  0x30   : > { %p37_p12 = por %p36_p6, %p35_p2  ;;  %p5179_p7 = por %p5556_p3, %p35_p2 }
  0x31   : > { %s183_s26 = sand.u32 1, %s5051_s17   ;;  %s4392_s28 = smul.u32 192, %s5055_s18 }
  0x32   : > { %s5557_s25 = scalar_select %p5179_p7, 1, 0 }
  0x33   : > { %s4391_s27 = smul.u32 12, %s183_s26  ;;  %p5186_p11 = pnand %p4425_p9, %p37_p12 }
  0x34   : > { %s5193_s6 = scalar_lea.hbm %s5543_s0, %s4392_s28  ;;  %s184_s9 = scalar_lea.sflag [#allocation3], %s183_s26 }
  0x35   : > { %s187_s7 = scalar_lea.vmem [#allocation2], %s4391_s27  ;;  %s4959_s10 = scalar_lea.hbm %s5193_s6, 192 }
  0x36   : > { %s195_s8 = sshll.u32 %s187_s7, 4  ;;  %p4960_p13 = scmp.ne.s32.totalorder %s5193_s6, %s4959_s10  ;;  %s196_s8 = int_to_ptr.vmem [resolvable:$true] %s195_s8 }
  0x37   : > { %p4961_p0 = pneg %p5186_p11  ;;  %s4964_s14 = scalar_lea.hbm %s5543_s0, 384 }
  0x38   : > { %p4965_p1 = scmp.lt.s32.totalorder %s5193_s6, %s5543_s0  ;;  %p4966_p2 = scmp.lt.s32.totalorder %s4964_s14, %s4959_s10 }
  0x39   : > { %p4962_p5 = pnand %p4961_p0, %p4960_p13 }
  0x3a   : > { %p4967_p6 = por %p4966_p2, %p4965_p1 }
  0x3b   : > { %p4963_p10 = pneg %p4962_p5 }
  0x3d   : > { %p4968_p12 = pnand %p4967_p6, %p4963_p10 }
  0x3f   : > { %4971 = shalt.err (!%p4968_p12)
}
  0x40   : > { %s4972_s27 = scalar_lea.vmem %s196_s8, 192  ;;  %s5063_s26 = smov [#allocation2]  }
  0x41   : > { %p4973_p3 = scmp.ne.s32.totalorder %s196_s8, %s4972_s27  ;;  %s4977_s30 = sshll.u32 %s5063_s26, 4  ;;  %s4978_s30 = int_to_ptr.vmem [resolvable:$false] %s4977_s30 }
  0x42   : > { %s4979_s5 = scalar_lea.vmem %s4978_s30, 384  ;;  %p4980_p13 = scmp.lt.s32.totalorder %s196_s8, %s4978_s30 }
  0x43   : > { %p4975_p9 = pnand %p4973_p3, %p4961_p0  ;;  %p4981_p5 = scmp.lt.s32.totalorder %s4979_s5, %s4972_s27 }
  0x45   : > { %p4976_p7 = pneg %p4975_p9  ;;  %p4982_p4 = por %p4981_p5, %p4980_p13 }
  0x47   : > { %p4983_p8 = pnand %p4982_p4, %p4976_p7 }
  0x49   : > { %4986 = shalt.err (!%p4983_p8)
}
  0x4a   : > { %4418 = dma.hbm_to_vmem [thread:$0]  (!%p5186_p11), %s5193_s6, 192, %s196_s8, %s184_s9  }
  0x4b   : > { %p5559_p10 = scmp.ne.s32.totalorder %s5554_s23, 0 }
  0x4c   : > { %s5212_s7 = sand.u32 (!%p5559_p10), 1, %s5047_s16   ;;  %p5560_p0 = scmp.ne.s32.totalorder (!%p5559_p10), %s5552_s21, 0 }
  0x4d   : > { %204 = sbr.rel (%p5559_p10) target bundleno = 3943 (0xf67), region = 36  ;;  %s207_s11 = scalar_lea.sflag (!%p5559_p10), [#allocation3], %s5212_s7 }
  0x4e   : > { %s4393_s10 = smul.u32 (!%p5559_p10), 12, %s5212_s7 }
  0x50   : > { %s5216_s12 = scalar_lea.vmem (!%p5559_p10), [#allocation2], %s4393_s10 }
  0x52   : > { %5030 = dma.done.wait (%p5560_p0), %s207_s11, 192  }
  0x53   : > { %5032 = vsyncadd (%p5560_p0), %s207_s11, 4294967104  ;;  %p5561_p4 = scmp.eq.s32.totalorder %s5115_s19, 0 }
  0x55   : > { %5034 = dma.done.wait (%p5561_p4), [#allocation6], 36864   ;;  %p5562_p8 = pmov %p5561_p4 }
  0x56   : > { %v5064_v0 = vmov 0   ;;  %v4471_v1 = vld [vmem:[#allocation5 + $0x1fc] ss:$36 sps:$4 sm:$0xff]   ;;  %v4477_v5 = vld [vmem:[#allocation5 + $0x1b4] ss:$36 sps:$4 sm:$0xff]   ;;  %vm5066_vm0 = vmmov 0  }
  0x57   : > { %5036 = vsyncadd (%p5562_p8), [#allocation6], 4294930432  ;;  %1674 = vmatprep.mubr.bf16.mxu1 %v5064_v0  ;;  %v4473_v2 = vld [vmem:[#allocation5 + $0x67c] ss:$36 sps:$4 sm:$0xff]   ;;  %1601 = vmatprep.subr.bf16.mxu0 %v4471_v1  ;;  %v4479_v6 = vld [vmem:[#allocation5 + $0x634] ss:$36 sps:$4 sm:$0xff]  }
  0x58   : > { %v4475_v3 = vld [vmem:[#allocation5 + $0x1f8] ss:$36 sps:$4 sm:$0xff]   ;;  %1642 = vmatprep.subr.bf16.mxu1 %v4473_v2  ;;  %v4481_v7 = vld [vmem:[#allocation5 + $0x1b0] ss:$36 sps:$4 sm:$0xff]   ;;  %v4487_v11 = vld [vmem:[#allocation5 + $0x168] ss:$36 sps:$4 sm:$0xff]  }
  0x59   : > { %v4476_v4 = vld [vmem:[#allocation5 + $0x678] ss:$36 sps:$4 sm:$0xff]   ;;  %1602 = vmatpush1.bf16.msra.mxu0 %v4475_v3  ;;  %v4482_v8 = vld [vmem:[#allocation5 + $0x630] ss:$36 sps:$4 sm:$0xff]   ;;  %v4488_v12 = vld [vmem:[#allocation5 + $0x5e8] ss:$36 sps:$4 sm:$0xff]  }
  0x5a   : > { %1643 = vmatpush1.bf16.msra.mxu1 %v4476_v4  ;;  %1603 = vmatprep.subr.bf16.mxu0 %v4477_v5  ;;  %v4483_v9 = vld [vmem:[#allocation5 + $0x16c] ss:$36 sps:$4 sm:$0xff]   ;;  %v4489_v13 = vld [vmem:[#allocation5 + $0x124] ss:$36 sps:$4 sm:$0xff]   ;;  %v4495_v17 = vld [vmem:[#allocation5 + $0xdc] ss:$36 sps:$4 sm:$0xff]  }
  0x5b   : > { %1644 = vmatprep.subr.bf16.mxu1 %v4479_v6  ;;  %v4485_v10 = vld [vmem:[#allocation5 + $0x5ec] ss:$36 sps:$4 sm:$0xff]   ;;  %v4491_v14 = vld [vmem:[#allocation5 + $0x5a4] ss:$36 sps:$4 sm:$0xff]   ;;  %v4497_v18 = vld [vmem:[#allocation5 + $0x55c] ss:$36 sps:$4 sm:$0xff]  }
  0x5c   : > { %v4493_v15 = vld [vmem:[#allocation5 + $0x120] ss:$36 sps:$4 sm:$0xff]   ;;  %v4499_v19 = vld [vmem:[#allocation5 + $0xd8] ss:$36 sps:$4 sm:$0xff]   ;;  %v4505_v23 = vld [vmem:[#allocation5 + $0x90] ss:$36 sps:$4 sm:$0xff]  }
  0x5d   : > { %1604 = vmatpush1.bf16.msra.mxu0 %v4481_v7  ;;  %v4494_v16 = vld [vmem:[#allocation5 + $0x5a0] ss:$36 sps:$4 sm:$0xff]   ;;  %v4500_v20 = vld [vmem:[#allocation5 + $0x558] ss:$36 sps:$4 sm:$0xff]   ;;  %v4506_v24 = vld [vmem:[#allocation5 + $0x510] ss:$36 sps:$4 sm:$0xff]  }
  0x5e   : > { %1645 = vmatpush1.bf16.msra.mxu1 %v4482_v8  ;;  %1605 = vmatprep.subr.bf16.mxu0 %v4483_v9  ;;  %v4501_v21 = vld [vmem:[#allocation5 + $0x94] ss:$36 sps:$4 sm:$0xff]   ;;  %v4507_v25 = vld [vmem:[#allocation5 + $0x4c] ss:$36 sps:$4 sm:$0xff]   ;;  %v4513_v29 = vld [vmem:[#allocation5 + $0x4] ss:$36 sps:$4 sm:$0xff]  }
  0x5f   : > { %1646 = vmatprep.subr.bf16.mxu1 %v4485_v10  ;;  %v4503_v22 = vld [vmem:[#allocation5 + $0x514] ss:$36 sps:$4 sm:$0xff]   ;;  %v4509_v26 = vld [vmem:[#allocation5 + $0x4cc] ss:$36 sps:$4 sm:$0xff]   ;;  %v4515_v30 = vld [vmem:[#allocation5 + $0x484] ss:$36 sps:$4 sm:$0xff]  }
  0x60   : > { %v4511_v27 = vld [vmem:[#allocation5 + $0x48] ss:$36 sps:$4 sm:$0xff]   ;;  %v4517_v31 = vld [vmem:[#allocation5] ss:$36 sps:$4 sm:$0xff]   ;;  %v5228_v35 = vld [vmem:[%s5216_s12 + $0x8] ss:$0 sps:$4 sm:$0xff]  }
  0x61   : > { %1606 = vmatpush1.bf16.msra.mxu0 %v4487_v11  ;;  %v4512_v28 = vld [vmem:[#allocation5 + $0x4c8] ss:$36 sps:$4 sm:$0xff]   ;;  %v4518_v32 = vld [vmem:[#allocation5 + $0x480] ss:$36 sps:$4 sm:$0xff]   ;;  %v4525_v37 = vld [vmem:[#allocation5 + $0x438] ss:$36 sps:$4 sm:$0xff]  }
  0x62   : > { %1647 = vmatpush1.bf16.msra.mxu1 %v4488_v12  ;;  %1607 = vmatprep.subr.bf16.mxu0 %v4489_v13  ;;  %v4519_v33 = vld [vmem:[#allocation5 + $0x43c] ss:$36 sps:$4 sm:$0xff]   ;;  %v4524_v34 = vld [vmem:[#allocation5 + $0x204] ss:$36 sps:$4 sm:$0xff]   ;;  %v4526_v38 = vld [vmem:[#allocation5 + $0x3f4] ss:$36 sps:$4 sm:$0xff]  }
  0x63   : > { %1648 = vmatprep.subr.bf16.mxu1 %v4491_v14  ;;  %v4522_v36 = vld [vmem:[#allocation5 + $0x200] ss:$36 sps:$4 sm:$0xff]   ;;  %v4528_v40 = vld [vmem:[#allocation5 + $0x1b8] ss:$36 sps:$4 sm:$0xff]   ;;  %v4531_v41 = vld [vmem:[#allocation5 + $0x3f0] ss:$36 sps:$4 sm:$0xff]  }
  0x64   : > { %v4530_v39 = vld [vmem:[#allocation5 + $0x1bc] ss:$36 sps:$4 sm:$0xff]   ;;  %v4532_v42 = vld [vmem:[#allocation5 + $0x3ac] ss:$36 sps:$4 sm:$0xff]   ;;  %v4536_v43 = vld [vmem:[#allocation5 + $0x174] ss:$36 sps:$4 sm:$0xff]  }
  0x65   : > { %1608 = vmatpush1.bf16.msra.mxu0 %v4493_v15  ;;  %v4534_v44 = vld [vmem:[#allocation5 + $0x170] ss:$36 sps:$4 sm:$0xff]   ;;  %v4537_v45 = vld [vmem:[#allocation5 + $0x3a8] ss:$36 sps:$4 sm:$0xff]   ;;  %v4543_v50 = vld [vmem:[#allocation5 + $0x360] ss:$36 sps:$4 sm:$0xff]  }
  0x66   : > { %1649 = vmatpush1.bf16.msra.mxu1 %v4494_v16  ;;  %1609 = vmatprep.subr.bf16.mxu0 %v4495_v17  ;;  %v4538_v46 = vld [vmem:[#allocation5 + $0x364] ss:$36 sps:$4 sm:$0xff]   ;;  %v4542_v47 = vld [vmem:[#allocation5 + $0x12c] ss:$36 sps:$4 sm:$0xff]   ;;  %v4544_v51 = vld [vmem:[#allocation5 + $0x31c] ss:$36 sps:$4 sm:$0xff]  }
  0x67   : > { %1650 = vmatprep.subr.bf16.mxu1 %v4497_v18  ;;  %v4540_v48 = vld [vmem:[#allocation5 + $0x128] ss:$36 sps:$4 sm:$0xff]   ;;  %v4546_v54 = vld [vmem:[#allocation5 + $0xe0] ss:$36 sps:$4 sm:$0xff]   ;;  %v4549_v55 = vld [vmem:[#allocation5 + $0x318] ss:$36 sps:$4 sm:$0xff]  }
  0x68   : > { %v244_v49 = vld [vmem:[%s5216_s12] sm:$0xff]  ;;  %v4554_v57 = vld [vmem:[#allocation5 + $0x9c] ss:$36 sps:$4 sm:$0xff]   ;;  %vm2034_vm1 = vcmask 523264   ;;  %s5067_s21 = smov 64   ;;  %vm2096_vm2 = vcmask 1043456  }
  0x69   : > { %1610 = vmatpush1.bf16.msra.mxu0 %v4499_v19  ;;  %v5232_v52 = vcombine.high %v244_v49, %v244_v49  ;;  %v4548_v53 = vld [vmem:[#allocation5 + $0xe4] ss:$36 sps:$4 sm:$0xff]   ;;  %v4550_v56 = vld [vmem:[#allocation5 + $0x2d4] ss:$36 sps:$4 sm:$0xff]   ;;  %v4556_v60 = vld [vmem:[#allocation5 + $0x28c] ss:$36 sps:$4 sm:$0xff]   ;;  %v5236_v7 = vcombine.low %v244_v49, %v244_v49 }
  0x6a   : > { %1651 = vmatpush1.bf16.msra.mxu1 %v4500_v20  ;;  %1611 = vmatprep.subr.bf16.mxu0 %v4501_v21  ;;  %v4552_v58 = vld [vmem:[#allocation5 + $0x98] ss:$36 sps:$4 sm:$0xff]   ;;  %v4555_v59 = vld [vmem:[#allocation5 + $0x2d0] ss:$36 sps:$4 sm:$0xff]   ;;  %v4561_v63 = vld [vmem:[#allocation5 + $0x288] ss:$36 sps:$4 sm:$0xff]  }
  0x6b   : > { %1652 = vmatprep.subr.bf16.mxu1 %v4503_v22  ;;  %1633 = vmatprep.mubr.bf16.mxu0 %v5232_v52  ;;  %v4560_v61 = vld [vmem:[#allocation5 + $0x54] ss:$36 sps:$4 sm:$0xff]   ;;  %v4562_v1 = vld [vmem:[#allocation5 + $0x244] ss:$36 sps:$4 sm:$0xff]   ;;  %v4566_v2 = vld [vmem:[#allocation5 + $0xc] ss:$36 sps:$4 sm:$0xff]  }
  0x6c   : > { %v4558_v62 = vld [vmem:[#allocation5 + $0x50] ss:$36 sps:$4 sm:$0xff]   ;;  %v4564_v3 = vld [vmem:[#allocation5 + $0x8] ss:$36 sps:$4 sm:$0xff]   ;;  %v4567_v4 = vld [vmem:[#allocation5 + $0x240] ss:$36 sps:$4 sm:$0xff]  }
  0x6d   : > { %1612 = vmatpush1.bf16.msra.mxu0 %v4505_v23  ;;  %v4572_v5 = vld [vmem:[#allocation5 + $0x444] ss:$36 sps:$4 sm:$0xff]   ;;  %v4578_v10 = vld [vmem:[#allocation5 + $0x3fc] ss:$36 sps:$4 sm:$0xff]   ;;  %v4584_v14 = vld [vmem:[#allocation5 + $0x3b4] ss:$36 sps:$4 sm:$0xff]  }
  0x6e   : > { %1653 = vmatpush1.bf16.msra.mxu1 %v4506_v24  ;;  %1613 = vmatprep.subr.bf16.mxu0 %v4507_v25  ;;  %v4575_v6 = vld [vmem:[#allocation5 + $0x684] ss:$36 sps:$4 sm:$0xff]   ;;  %v4581_v11 = vld [vmem:[#allocation5 + $0x63c] ss:$36 sps:$4 sm:$0xff]   ;;  %v4587_v15 = vld [vmem:[#allocation5 + $0x5f4] ss:$36 sps:$4 sm:$0xff]  }
  0x6f   : > { %1654 = vmatprep.subr.bf16.mxu1 %v4509_v26  ;;  %v4570_v8 = vld [vmem:[#allocation5 + $0x440] ss:$36 sps:$4 sm:$0xff]   ;;  %v4576_v12 = vld [vmem:[#allocation5 + $0x3f8] ss:$36 sps:$4 sm:$0xff]   ;;  %v4582_v16 = vld [vmem:[#allocation5 + $0x3b0] ss:$36 sps:$4 sm:$0xff]  }
  0x70   : > { %v4573_v9 = vld [vmem:[#allocation5 + $0x680] ss:$36 sps:$4 sm:$0xff]   ;;  %v4579_v13 = vld [vmem:[#allocation5 + $0x638] ss:$36 sps:$4 sm:$0xff]   ;;  %v4585_v17 = vld [vmem:[#allocation5 + $0x5f0] ss:$36 sps:$4 sm:$0xff]  }
  0x71   : > { %1614 = vmatpush1.bf16.msra.mxu0 %v4511_v27  ;;  %v4590_v18 = vld [vmem:[#allocation5 + $0x36c] ss:$36 sps:$4 sm:$0xff]   ;;  %v4596_v22 = vld [vmem:[#allocation5 + $0x324] ss:$36 sps:$4 sm:$0xff]   ;;  %v4602_v26 = vld [vmem:[#allocation5 + $0x2dc] ss:$36 sps:$4 sm:$0xff]  }
  0x72   : > { %1655 = vmatpush1.bf16.msra.mxu1 %v4512_v28  ;;  %1615 = vmatprep.subr.bf16.mxu0 %v4513_v29  ;;  %v4593_v19 = vld [vmem:[#allocation5 + $0x5ac] ss:$36 sps:$4 sm:$0xff]   ;;  %v4599_v23 = vld [vmem:[#allocation5 + $0x564] ss:$36 sps:$4 sm:$0xff]   ;;  %v4605_v27 = vld [vmem:[#allocation5 + $0x51c] ss:$36 sps:$4 sm:$0xff]  }
  0x73   : > { %1656 = vmatprep.subr.bf16.mxu1 %v4515_v30  ;;  %v4588_v20 = vld [vmem:[#allocation5 + $0x368] ss:$36 sps:$4 sm:$0xff]   ;;  %v4594_v24 = vld [vmem:[#allocation5 + $0x320] ss:$36 sps:$4 sm:$0xff]   ;;  %v4600_v28 = vld [vmem:[#allocation5 + $0x2d8] ss:$36 sps:$4 sm:$0xff]  }
  0x74   : > { %v4591_v21 = vld [vmem:[#allocation5 + $0x5a8] ss:$36 sps:$4 sm:$0xff]   ;;  %v4597_v25 = vld [vmem:[#allocation5 + $0x560] ss:$36 sps:$4 sm:$0xff]   ;;  %v4603_v29 = vld [vmem:[#allocation5 + $0x518] ss:$36 sps:$4 sm:$0xff]  }
  0x75   : > { %1616 = vmatpush1.bf16.msra.mxu0 %v4517_v31  ;;  %v4608_v30 = vld [vmem:[#allocation5 + $0x294] ss:$36 sps:$4 sm:$0xff]   ;;  %vm2082_vm4 = vcmask 64512   ;;  %s4394_s6 = smul.u32 24, %s5212_s7  ;;  %s3712_s27 = scalar_lea.sflag [#allocation4], %s5212_s7 }
  0x76   : > { %1657 = vmatpush1.bf16.msra.mxu1 %v4518_v32  ;;  %1617 = vmatprep.subr.bf16.mxu0 %v4519_v33  ;;  %v4611_v31 = vld [vmem:[#allocation5 + $0x4d4] ss:$36 sps:$4 sm:$0xff]   ;;  %s4395_s8 = smul.u32 384, %s5115_s19  ;;  %p5565_p11 = scmp.ne.s32.totalorder %s5557_s25, 0 }
  0x77   : > { %1683 = vmatprep.subr.bf16.mxu1 %v4524_v34  ;;  %v4606_v32 = vld [vmem:[#allocation5 + $0x290] ss:$36 sps:$4 sm:$0xff]   ;;  %v4627_v49 = vld [vmem:[#allocation5 + $0x178] ss:$36 sps:$4 sm:$0xff]   ;;  %s242_s9 = scalar_lea.vmem [#allocation8], %s4394_s6  ;;  %s5068_s30 = smov [#allocation8]  }
  0x78   : > { %v4609_v33 = vld [vmem:[#allocation5 + $0x4d0] ss:$36 sps:$4 sm:$0xff]   ;;  %s3726_s14 = sshll.u32 %s242_s9, 4  ;;  %s5500_s19 = scalar_lea.hbm %s5547_s4, %s4395_s8  ;;  %s5502_s14 = int_to_ptr.vmem [resolvable:$true] %s3726_s14 }
  0x79   : > { %1675 = vmatmul.mubr.bf16.vlgmr.msra.gmra.mxu1 %v5228_v35  ;;  %1618 = vmatpush2.bf16.msra.mxu0 %v4525_v37  ;;  %v4614_v34 = vld [vmem:[#allocation5 + $0x24c] ss:$36 sps:$4 sm:$0xff]   ;;  %s4987_s26 = scalar_lea.vmem %s5502_s14, 384  ;;  %s4991_s5 = sshll.u32 %s5068_s30, 4  ;;  %s4992_s5 = int_to_ptr.vmem [resolvable:$false] %s4991_s5 }
  0x7a   : > { %1684 = vmatpush1.bf16.msra.mxu1 %v4522_v36  ;;  %1619 = vmatprep.subr.bf16.mxu0 %v4526_v38  ;;  %v4617_v36 = vld [vmem:[#allocation5 + $0x48c] ss:$36 sps:$4 sm:$0xff]   ;;  %p4988_p7 = scmp.ne.s32.totalorder %s5502_s14, %s4987_s26  ;;  %s4993_s10 = scalar_lea.vmem %s4992_s5, 768 }
  0x7b   : > { %1685 = vmatprep.subr.bf16.mxu1 %v4530_v39  ;;  %1715 = vmatprep.mubr.bf16.mxu1 %v5232_v52  ;;  %v4612_v37 = vld [vmem:[#allocation5 + $0x248] ss:$36 sps:$4 sm:$0xff]   ;;  %p4994_p6 = scmp.lt.s32.totalorder %s5502_s14, %s4992_s5  ;;  %p4995_p12 = scmp.lt.s32.totalorder %s4993_s10, %s4987_s26 }
  0x7c   : > { %v4615_v38 = vld [vmem:[#allocation5 + $0x488] ss:$36 sps:$4 sm:$0xff]   ;;  %p4989_p1 = pnand %p4988_p7, %p5565_p11 }
  0x7d   : > { %1620 = vmatpush2.bf16.msra.mxu0 %v4531_v41  ;;  %v4620_v39 = vld [vmem:[#allocation5 + $0x20c] ss:$36 sps:$4 sm:$0xff]   ;;  %p4996_p3 = por %p4995_p12, %p4994_p6 }
  0x7e   : > { %1686 = vmatpush1.bf16.msra.mxu1 %v4528_v40  ;;  %1621 = vmatprep.subr.bf16.mxu0 %v4532_v42  ;;  %v4626_v40 = vld [vmem:[#allocation5 + $0x68c] ss:$36 sps:$4 sm:$0xff]   ;;  %v4623_v42 = vld [vmem:[#allocation5 + $0x1c4] ss:$36 sps:$4 sm:$0xff]   ;;  %p4990_p2 = pneg %p4989_p1 }
  0x7f   : > { %1687 = vmatprep.subr.bf16.mxu1 %v4536_v43  ;;  %v4618_v41 = vld [vmem:[#allocation5 + $0x208] ss:$36 sps:$4 sm:$0xff]  }
  0x80   : > { %v4624_v43 = vld [vmem:[#allocation5 + $0x688] ss:$36 sps:$4 sm:$0xff]   ;;  %p4997_p9 = pnand %p4996_p3, %p4990_p2 }
  0x81   : > { %1622 = vmatpush2.bf16.msra.mxu0 %v4537_v45  ;;  %v4621_v45 = vld [vmem:[#allocation5 + $0x1c0] ss:$36 sps:$4 sm:$0xff]  }
  0x82   : > { %1688 = vmatpush1.bf16.msra.mxu1 %v4534_v44  ;;  %1623 = vmatprep.subr.bf16.mxu0 %v4538_v46  ;;  %v4632_v44 = vld [vmem:[#allocation5 + $0x644] ss:$36 sps:$4 sm:$0xff]   ;;  %v4629_v46 = vld [vmem:[#allocation5 + $0x17c] ss:$36 sps:$4 sm:$0xff]  }
  0x83   : > { %1689 = vmatprep.subr.bf16.mxu1 %v4542_v47  ;;  %v4630_v47 = vld [vmem:[#allocation5 + $0x640] ss:$36 sps:$4 sm:$0xff]  }
  0x85   : > { %1624 = vmatpush2.bf16.msra.mxu0 %v4543_v50  ;;  %v4635_v50 = vld [vmem:[#allocation5 + $0x134] ss:$36 sps:$4 sm:$0xff]  }
  0x86   : > { %1690 = vmatpush1.bf16.msra.mxu1 %v4540_v48  ;;  %1625 = vmatprep.subr.bf16.mxu0 %v4544_v51  ;;  %v4638_v48 = vld [vmem:[#allocation5 + $0x5fc] ss:$36 sps:$4 sm:$0xff]  }
  0x87   : > { %1691 = vmatprep.subr.bf16.mxu1 %v4548_v53  ;;  %v4636_v51 = vld [vmem:[#allocation5 + $0x5f8] ss:$36 sps:$4 sm:$0xff]  }
  0x88   : > { %v4644_v53 = vld [vmem:[#allocation5 + $0x5b4] ss:$36 sps:$4 sm:$0xff]  }
  0x89   : > { %1626 = vmatpush2.bf16.msra.mxu0 %v4549_v55  ;;  %v4641_v55 = vld [vmem:[#allocation5 + $0xec] ss:$36 sps:$4 sm:$0xff]  }
  0x8a   : > { %1692 = vmatpush1.bf16.msra.mxu1 %v4546_v54  ;;  %1627 = vmatprep.subr.bf16.mxu0 %v4550_v56  ;;  %v4633_v54 = vld [vmem:[#allocation5 + $0x130] ss:$36 sps:$4 sm:$0xff]  }
  0x8b   : > { %1693 = vmatprep.subr.bf16.mxu1 %v4554_v57  ;;  %v4642_v56 = vld [vmem:[#allocation5 + $0x5b0] ss:$36 sps:$4 sm:$0xff]  }
  0x8c   : > { %v4650_v57 = vld [vmem:[#allocation5 + $0x56c] ss:$36 sps:$4 sm:$0xff]  }
  0x8d   : > { %1628 = vmatpush2.bf16.msra.mxu0 %v4555_v59  ;;  %v4647_v59 = vld [vmem:[#allocation5 + $0xa4] ss:$36 sps:$4 sm:$0xff]  }
  0x8e   : > { %1694 = vmatpush1.bf16.msra.mxu1 %v4552_v58  ;;  %1629 = vmatprep.subr.bf16.mxu0 %v4556_v60  ;;  %v4639_v58 = vld [vmem:[#allocation5 + $0xe8] ss:$36 sps:$4 sm:$0xff]  }
  0x8f   : > { %1695 = vmatprep.subr.bf16.mxu1 %v4560_v61  ;;  %v4648_v60 = vld [vmem:[#allocation5 + $0x568] ss:$36 sps:$4 sm:$0xff]  }
  0x90   : > { %v4656_v61 = vld [vmem:[#allocation5 + $0x524] ss:$36 sps:$4 sm:$0xff]  }
  0x91   : > { %1630 = vmatpush2.bf16.msra.mxu0 %v4561_v63  ;;  %v4653_v63 = vld [vmem:[#allocation5 + $0x5c] ss:$36 sps:$4 sm:$0xff]  }
  0x92   : > { %1696 = vmatpush1.bf16.msra.mxu1 %v4558_v62  ;;  %1631 = vmatprep.subr.bf16.mxu0 %v4562_v1  ;;  %v4645_v62 = vld [vmem:[#allocation5 + $0xa0] ss:$36 sps:$4 sm:$0xff]  }
  0x93   : > { %1697 = vmatprep.subr.bf16.mxu1 %v4566_v2  ;;  %v4654_v1 = vld [vmem:[#allocation5 + $0x520] ss:$36 sps:$4 sm:$0xff]  }
  0x94   : > { %v4662_v2 = vld [vmem:[#allocation5 + $0x4dc] ss:$36 sps:$4 sm:$0xff]  }
  0x95   : > { %1632 = vmatpush2.bf16.msra.mxu0 %v4567_v4  ;;  %v4659_v4 = vld [vmem:[#allocation5 + $0x14] ss:$36 sps:$4 sm:$0xff]  }
  0x96   : > { %1698 = vmatpush1.bf16.msra.mxu1 %v4564_v3  ;;  %1724 = vmatprep.subr.bf16.mxu0 %v4575_v6  ;;  %v4651_v3 = vld [vmem:[#allocation5 + $0x58] ss:$36 sps:$4 sm:$0xff]  }
  0x97   : > { %1699 = vmatprep.subr.bf16.mxu1 %v4572_v5  ;;  %v4660_v5 = vld [vmem:[#allocation5 + $0x4d8] ss:$36 sps:$4 sm:$0xff]  }
  0x98   : > { %1634 = vmatmul.mubr.bf16.vlgmr.msra.gmra.mxu0 %v5236_v7  ;;  %v4668_v6 = vld [vmem:[#allocation5 + $0x494] ss:$36 sps:$4 sm:$0xff]  }
  0x99   : > { %1725 = vmatpush1.bf16.msra.mxu0 %v4573_v9  ;;  %1756 = vmatprep.mubr.bf16.mxu0 %v5064_v0  ;;  %v4665_v9 = vld [vmem:[#allocation5 + $0x44c] ss:$36 sps:$4 sm:$0xff]  }
  0x9a   : > { %1700 = vmatpush2.bf16.msra.mxu1 %v4570_v8  ;;  %1726 = vmatprep.subr.bf16.mxu0 %v4581_v11  ;;  %v4657_v8 = vld [vmem:[#allocation5 + $0x10] ss:$36 sps:$4 sm:$0xff]  }
  0x9b   : > { %1701 = vmatprep.subr.bf16.mxu1 %v4578_v10  ;;  %v4666_v10 = vld [vmem:[#allocation5 + $0x490] ss:$36 sps:$4 sm:$0xff]  }
  0x9c   : > { %v4674_v11 = vld [vmem:[#allocation5 + $0x214] ss:$36 sps:$4 sm:$0xff]  }
  0x9d   : > { %1727 = vmatpush1.bf16.msra.mxu0 %v4579_v13  ;;  %v4671_v13 = vld [vmem:[#allocation5 + $0x404] ss:$36 sps:$4 sm:$0xff]  }
  0x9e   : > { %1702 = vmatpush2.bf16.msra.mxu1 %v4576_v12  ;;  %1728 = vmatprep.subr.bf16.mxu0 %v4587_v15  ;;  %v4663_v12 = vld [vmem:[#allocation5 + $0x448] ss:$36 sps:$4 sm:$0xff]  }
  0x9f   : > { %1703 = vmatprep.subr.bf16.mxu1 %v4584_v14  ;;  %v4672_v14 = vld [vmem:[#allocation5 + $0x210] ss:$36 sps:$4 sm:$0xff]  }
  0xa0   : > { %v4680_v15 = vld [vmem:[#allocation5 + $0x1cc] ss:$36 sps:$4 sm:$0xff]  }
  0xa1   : > { %1729 = vmatpush1.bf16.msra.mxu0 %v4585_v17  ;;  %v4677_v17 = vld [vmem:[#allocation5 + $0x3bc] ss:$36 sps:$4 sm:$0xff]  }
  0xa2   : > { %1704 = vmatpush2.bf16.msra.mxu1 %v4582_v16  ;;  %1730 = vmatprep.subr.bf16.mxu0 %v4593_v19  ;;  %v4669_v16 = vld [vmem:[#allocation5 + $0x400] ss:$36 sps:$4 sm:$0xff]  }
  0xa3   : > { %1705 = vmatprep.subr.bf16.mxu1 %v4590_v18  ;;  %v4678_v18 = vld [vmem:[#allocation5 + $0x1c8] ss:$36 sps:$4 sm:$0xff]  }
  0xa4   : > { %v4686_v19 = vld [vmem:[#allocation5 + $0x184] ss:$36 sps:$4 sm:$0xff]  }
  0xa5   : > { %1731 = vmatpush1.bf16.msra.mxu0 %v4591_v21  ;;  %v4684_v21 = vld [vmem:[#allocation5 + $0x180] ss:$36 sps:$4 sm:$0xff]  }
  0xa6   : > { %1706 = vmatpush2.bf16.msra.mxu1 %v4588_v20  ;;  %1732 = vmatprep.subr.bf16.mxu0 %v4599_v23  ;;  %v4675_v20 = vld [vmem:[#allocation5 + $0x3b8] ss:$36 sps:$4 sm:$0xff]  }
  0xa7   : > { %1707 = vmatprep.subr.bf16.mxu1 %v4596_v22  ;;  %v4683_v22 = vld [vmem:[#allocation5 + $0x374] ss:$36 sps:$4 sm:$0xff]   ;;  %v4692_v23 = vld [vmem:[#allocation5 + $0x13c] ss:$36 sps:$4 sm:$0xff]  }
  0xa9   : > { %1733 = vmatpush1.bf16.msra.mxu0 %v4597_v25  ;;  %v4689_v25 = vld [vmem:[#allocation5 + $0x32c] ss:$36 sps:$4 sm:$0xff]  }
  0xaa   : > { %1708 = vmatpush2.bf16.msra.mxu1 %v4594_v24  ;;  %1734 = vmatprep.subr.bf16.mxu0 %v4605_v27  ;;  %v4681_v24 = vld [vmem:[#allocation5 + $0x370] ss:$36 sps:$4 sm:$0xff]   ;;  %v4687_v27 = vld [vmem:[#allocation5 + $0x328] ss:$36 sps:$4 sm:$0xff]  }
  0xab   : > { %1709 = vmatprep.subr.bf16.mxu1 %v4602_v26  ;;  %v4698_v26 = vld [vmem:[#allocation5 + $0xf4] ss:$36 sps:$4 sm:$0xff]  }
  0xad   : > { %1735 = vmatpush1.bf16.msra.mxu0 %v4603_v29  ;;  %v4696_v29 = vld [vmem:[#allocation5 + $0xf0] ss:$36 sps:$4 sm:$0xff]  }
  0xae   : > { %1710 = vmatpush2.bf16.msra.mxu1 %v4600_v28  ;;  %1736 = vmatprep.subr.bf16.mxu0 %v4611_v31  ;;  %v4695_v28 = vld [vmem:[#allocation5 + $0x2e4] ss:$36 sps:$4 sm:$0xff]  }
  0xaf   : > { %1711 = vmatprep.subr.bf16.mxu1 %v4608_v30  ;;  %v4704_v30 = vld [vmem:[#allocation5 + $0xac] ss:$36 sps:$4 sm:$0xff]   ;;  %v4693_v31 = vld [vmem:[#allocation5 + $0x2e0] ss:$36 sps:$4 sm:$0xff]  }
  0xb1   : > { %1737 = vmatpush1.bf16.msra.mxu0 %v4609_v33  ;;  %v4702_v33 = vld [vmem:[#allocation5 + $0xa8] ss:$36 sps:$4 sm:$0xff]  }
  0xb2   : > { %1712 = vmatpush2.bf16.msra.mxu1 %v4606_v32  ;;  %1738 = vmatprep.subr.bf16.mxu0 %v4617_v36  ;;  %v4701_v32 = vld [vmem:[#allocation5 + $0x29c] ss:$36 sps:$4 sm:$0xff]  }
  0xb3   : > { %1713 = vmatprep.subr.bf16.mxu1 %v4614_v34  ;;  %v4710_v34 = vld [vmem:[#allocation5 + $0x64] ss:$36 sps:$4 sm:$0xff]   ;;  %v4699_v36 = vld [vmem:[#allocation5 + $0x298] ss:$36 sps:$4 sm:$0xff]  }
  0xb5   : > { %1739 = vmatpush1.bf16.msra.mxu0 %v4615_v38  ;;  %v4707_v38 = vld [vmem:[#allocation5 + $0x254] ss:$36 sps:$4 sm:$0xff]  }
  0xb6   : > { %1714 = vmatpush2.bf16.msra.mxu1 %v4612_v37  ;;  %1765 = vmatprep.subr.bf16.mxu0 %v4620_v39  ;;  %v4708_v37 = vld [vmem:[#allocation5 + $0x60] ss:$36 sps:$4 sm:$0xff]  }
  0xb7   : > { %1806 = vmatprep.subr.bf16.mxu1 %v4626_v40  ;;  %v4713_v39 = vld [vmem:[#allocation5 + $0x1c] ss:$36 sps:$4 sm:$0xff]   ;;  %v4705_v40 = vld [vmem:[#allocation5 + $0x250] ss:$36 sps:$4 sm:$0xff]  }
  0xb8   : > { %1757 = vmatmul.mubr.bf16.vlgmr.msra.gmra.mxu0 %v5228_v35 }
  0xb9   : > { %1716 = vmatmul.mubr.bf16.vlgmr.msra.gmra.mxu1 %v5236_v7  ;;  %1766 = vmatpush1.bf16.msra.mxu0 %v4618_v41  ;;  %v4711_v41 = vld [vmem:[#allocation5 + $0x18] ss:$36 sps:$4 sm:$0xff]  }
  0xba   : > { %1807 = vmatpush1.bf16.msra.mxu1 %v4624_v43  ;;  %1767 = vmatprep.subr.bf16.mxu0 %v4623_v42  ;;  %v4716_v42 = vld [vmem:[#allocation5 + $0x694] ss:$36 sps:$4 sm:$0xff]  }
  0xbb   : > { %1808 = vmatprep.subr.bf16.mxu1 %v4632_v44  ;;  %1838 = vmatprep.mubr.bf16.mxu1 %v5064_v0  ;;  %v4719_v43 = vld [vmem:[#allocation5 + $0x454] ss:$36 sps:$4 sm:$0xff]  }
  0xbc   : > { %1797 = vmatprep.mubr.bf16.mxu0 %v5232_v52  ;;  %v4714_v44 = vld [vmem:[#allocation5 + $0x690] ss:$36 sps:$4 sm:$0xff]  }
  0xbd   : > { %1768 = vmatpush1.bf16.msra.mxu0 %v4621_v45  ;;  %v4717_v45 = vld [vmem:[#allocation5 + $0x450] ss:$36 sps:$4 sm:$0xff]  }
  0xbe   : > { %1809 = vmatpush1.bf16.msra.mxu1 %v4630_v47  ;;  %1769 = vmatprep.subr.bf16.mxu0 %v4629_v46  ;;  %v4722_v46 = vld [vmem:[#allocation5 + $0x64c] ss:$36 sps:$4 sm:$0xff]  }
  0xbf   : > { %1810 = vmatprep.subr.bf16.mxu1 %v4638_v48  ;;  %v4725_v47 = vld [vmem:[#allocation5 + $0x40c] ss:$36 sps:$4 sm:$0xff]  }
  0xc0   : > { %v4720_v48 = vld [vmem:[#allocation5 + $0x648] ss:$36 sps:$4 sm:$0xff]  }
  0xc1   : > { %1770 = vmatpush1.bf16.msra.mxu0 %v4627_v49  ;;  %v4723_v49 = vld [vmem:[#allocation5 + $0x408] ss:$36 sps:$4 sm:$0xff]  }
  0xc2   : > { %1811 = vmatpush1.bf16.msra.mxu1 %v4636_v51  ;;  %1771 = vmatprep.subr.bf16.mxu0 %v4635_v50  ;;  %v4728_v50 = vld [vmem:[#allocation5 + $0x604] ss:$36 sps:$4 sm:$0xff]  }
  0xc3   : > { %1812 = vmatprep.subr.bf16.mxu1 %v4644_v53  ;;  %v4731_v51 = vld [vmem:[#allocation5 + $0x3c4] ss:$36 sps:$4 sm:$0xff]  }
  0xc4   : > { %v4726_v53 = vld [vmem:[#allocation5 + $0x600] ss:$36 sps:$4 sm:$0xff]  }
  0xc5   : > { %1772 = vmatpush1.bf16.msra.mxu0 %v4633_v54  ;;  %v4729_v54 = vld [vmem:[#allocation5 + $0x3c0] ss:$36 sps:$4 sm:$0xff]  }
  0xc6   : > { %1813 = vmatpush1.bf16.msra.mxu1 %v4642_v56  ;;  %1773 = vmatprep.subr.bf16.mxu0 %v4641_v55  ;;  %v4734_v55 = vld [vmem:[#allocation5 + $0x5bc] ss:$36 sps:$4 sm:$0xff]  }
  0xc7   : > { %1814 = vmatprep.subr.bf16.mxu1 %v4650_v57  ;;  %v4737_v56 = vld [vmem:[#allocation5 + $0x37c] ss:$36 sps:$4 sm:$0xff]  }
  0xc8   : > { %v4732_v57 = vld [vmem:[#allocation5 + $0x5b8] ss:$36 sps:$4 sm:$0xff]  }
  0xc9   : > { %1774 = vmatpush1.bf16.msra.mxu0 %v4639_v58  ;;  %v4735_v58 = vld [vmem:[#allocation5 + $0x378] ss:$36 sps:$4 sm:$0xff]  }
  0xca   : > { %1815 = vmatpush1.bf16.msra.mxu1 %v4648_v60  ;;  %1775 = vmatprep.subr.bf16.mxu0 %v4647_v59  ;;  %v4740_v59 = vld [vmem:[#allocation5 + $0x574] ss:$36 sps:$4 sm:$0xff]  }
  0xcb   : > { %1816 = vmatprep.subr.bf16.mxu1 %v4656_v61  ;;  %v4743_v60 = vld [vmem:[#allocation5 + $0x334] ss:$36 sps:$4 sm:$0xff]  }
  0xcc   : > { %v4738_v61 = vld [vmem:[#allocation5 + $0x570] ss:$36 sps:$4 sm:$0xff]  }
  0xcd   : > { %1776 = vmatpush1.bf16.msra.mxu0 %v4645_v62  ;;  %v4741_v62 = vld [vmem:[#allocation5 + $0x330] ss:$36 sps:$4 sm:$0xff]  }
  0xce   : > { %1817 = vmatpush1.bf16.msra.mxu1 %v4654_v1  ;;  %1777 = vmatprep.subr.bf16.mxu0 %v4653_v63  ;;  %v4746_v63 = vld [vmem:[#allocation5 + $0x52c] ss:$36 sps:$4 sm:$0xff]  }
  0xcf   : > { %1818 = vmatprep.subr.bf16.mxu1 %v4662_v2  ;;  %v4749_v1 = vld [vmem:[#allocation5 + $0x2ec] ss:$36 sps:$4 sm:$0xff]  }
  0xd0   : > { %v4744_v2 = vld [vmem:[#allocation5 + $0x528] ss:$36 sps:$4 sm:$0xff]  }
  0xd1   : > { %1778 = vmatpush1.bf16.msra.mxu0 %v4651_v3  ;;  %v4747_v3 = vld [vmem:[#allocation5 + $0x2e8] ss:$36 sps:$4 sm:$0xff]  }
  0xd2   : > { %1819 = vmatpush1.bf16.msra.mxu1 %v4660_v5  ;;  %1779 = vmatprep.subr.bf16.mxu0 %v4659_v4  ;;  %v4752_v4 = vld [vmem:[#allocation5 + $0x4e4] ss:$36 sps:$4 sm:$0xff]  }
  0xd3   : > { %1820 = vmatprep.subr.bf16.mxu1 %v4668_v6  ;;  %v4755_v5 = vld [vmem:[#allocation5 + $0x2a4] ss:$36 sps:$4 sm:$0xff]  }
  0xd4   : > { %v4750_v6 = vld [vmem:[#allocation5 + $0x4e0] ss:$36 sps:$4 sm:$0xff]  }
  0xd5   : > { %1780 = vmatpush1.bf16.msra.mxu0 %v4657_v8  ;;  %v4753_v8 = vld [vmem:[#allocation5 + $0x2a0] ss:$36 sps:$4 sm:$0xff]  }
  0xd6   : > { %1821 = vmatpush1.bf16.msra.mxu1 %v4666_v10  ;;  %1781 = vmatprep.subr.bf16.mxu0 %v4665_v9  ;;  %v4758_v9 = vld [vmem:[#allocation5 + $0x49c] ss:$36 sps:$4 sm:$0xff]  }
  0xd7   : > { %1847 = vmatprep.subr.bf16.mxu1 %v4674_v11  ;;  %v4761_v10 = vld [vmem:[#allocation5 + $0x25c] ss:$36 sps:$4 sm:$0xff]  }
  0xd8   : > { %v4756_v11 = vld [vmem:[#allocation5 + $0x498] ss:$36 sps:$4 sm:$0xff]  }
  0xd9   : > { %1839 = vmatmul.mubr.bf16.vlgmr.msra.gmra.mxu1 %v5228_v35  ;;  %1782 = vmatpush2.bf16.msra.mxu0 %v4663_v12  ;;  %v4690_v35 = vld [vmem:[#allocation5 + $0x138] ss:$36 sps:$4 sm:$0xff]  }
  0xda   : > { %1848 = vmatpush1.bf16.msra.mxu1 %v4672_v14  ;;  %1783 = vmatprep.subr.bf16.mxu0 %v4671_v13  ;;  %v4759_v12 = vld [vmem:[#allocation5 + $0x258] ss:$36 sps:$4 sm:$0xff]  }
  0xdb   : > { %1849 = vmatprep.subr.bf16.mxu1 %v4680_v15  ;;  %1879 = vmatprep.mubr.bf16.mxu1 %v5232_v52  ;;  %v4762_v13 = vld [vmem:[#allocation5 + $0x458] ss:$36 sps:$4 sm:$0xff]  }
  0xdc   : > { %v4763_v14 = vld [vmem:[#allocation5 + $0x218] ss:$36 sps:$4 sm:$0xff]  }
  0xdd   : > { %1784 = vmatpush2.bf16.msra.mxu0 %v4669_v16  ;;  %v4768_v15 = vld [vmem:[#allocation5 + $0x698] ss:$36 sps:$4 sm:$0xff]   ;;  %v4764_v16 = vld [vmem:[#allocation5 + $0x410] ss:$36 sps:$4 sm:$0xff]  }
  0xde   : > { %1850 = vmatpush1.bf16.msra.mxu1 %v4678_v18  ;;  %1785 = vmatprep.subr.bf16.mxu0 %v4677_v17  ;;  %v5065_v17 = vmov 0.0   ;;  %v4906_v18 = vld [vmem:[%s5216_s12 + $0x8] ss:$0 sps:$4 sm:$0xff]  }
  0xdf   : > { %1851 = vmatprep.subr.bf16.mxu1 %v4686_v19  ;;  %v4765_v19 = vld [vmem:[#allocation5 + $0x1d0] ss:$36 sps:$4 sm:$0xff]  }
  0xe1   : > { %1786 = vmatpush2.bf16.msra.mxu0 %v4675_v20  ;;  %v4771_v20 = vld [vmem:[#allocation5 + $0x650] ss:$36 sps:$4 sm:$0xff]  }
  0xe2   : > { %1852 = vmatpush1.bf16.msra.mxu1 %v4684_v21  ;;  %1787 = vmatprep.subr.bf16.mxu0 %v4683_v22  ;;  %v4766_v21 = vld [vmem:[#allocation5 + $0x3c8] ss:$36 sps:$4 sm:$0xff]  }
  0xe3   : > { %1853 = vmatprep.subr.bf16.mxu1 %v4692_v23  ;;  %v4767_v22 = vld [vmem:[#allocation5 + $0x188] ss:$36 sps:$4 sm:$0xff]  }
  0xe4   : > { %v4774_v23 = vld [vmem:[#allocation5 + $0x608] ss:$36 sps:$4 sm:$0xff]  }
  0xe5   : > { %1788 = vmatpush2.bf16.msra.mxu0 %v4681_v24  ;;  %v4769_v24 = vld [vmem:[#allocation5 + $0x380] ss:$36 sps:$4 sm:$0xff]  }
  0xe6   : > { %1854 = vmatpush1.bf16.msra.mxu1 %v4690_v35  ;;  %1789 = vmatprep.subr.bf16.mxu0 %v4689_v25  ;;  %v4770_v25 = vld [vmem:[#allocation5 + $0x140] ss:$36 sps:$4 sm:$0xff]  }
  0xe7   : > { %1855 = vmatprep.subr.bf16.mxu1 %v4698_v26  ;;  %v4777_v35 = vld [vmem:[#allocation5 + $0x5c0] ss:$36 sps:$4 sm:$0xff]   ;;  %v4772_v26 = vld [vmem:[#allocation5 + $0x338] ss:$36 sps:$4 sm:$0xff]  }
  0xe9   : > { %1790 = vmatpush2.bf16.msra.mxu0 %v4687_v27  ;;  %v4780_v27 = vld [vmem:[#allocation5 + $0x578] ss:$36 sps:$4 sm:$0xff]  }
  0xea   : > { %1856 = vmatpush1.bf16.msra.mxu1 %v4696_v29  ;;  %1791 = vmatprep.subr.bf16.mxu0 %v4695_v28  ;;  %v4775_v28 = vld [vmem:[#allocation5 + $0x2f0] ss:$36 sps:$4 sm:$0xff]  }
  0xeb   : > { %1857 = vmatprep.subr.bf16.mxu1 %v4704_v30  ;;  %v4776_v29 = vld [vmem:[#allocation5 + $0xb0] ss:$36 sps:$4 sm:$0xff]  }
  0xec   : > { %v4783_v30 = vld [vmem:[#allocation5 + $0x530] ss:$36 sps:$4 sm:$0xff]  }
  0xed   : > { %1792 = vmatpush2.bf16.msra.mxu0 %v4693_v31  ;;  %v4778_v31 = vld [vmem:[#allocation5 + $0x2a8] ss:$36 sps:$4 sm:$0xff]  }
  0xee   : > { %1858 = vmatpush1.bf16.msra.mxu1 %v4702_v33  ;;  %1793 = vmatprep.subr.bf16.mxu0 %v4701_v32  ;;  %v4779_v32 = vld [vmem:[#allocation5 + $0x68] ss:$36 sps:$4 sm:$0xff]  }
  0xef   : > { %1859 = vmatprep.subr.bf16.mxu1 %v4710_v34  ;;  %v4784_v33 = vld [vmem:[#allocation5 + $0x4e8] ss:$36 sps:$4 sm:$0xff]   ;;  %v4781_v34 = vld [vmem:[#allocation5 + $0x260] ss:$36 sps:$4 sm:$0xff]  }
  0xf1   : > { %1794 = vmatpush2.bf16.msra.mxu0 %v4699_v36  ;;  %v4782_v36 = vld [vmem:[#allocation5 + $0x20] ss:$36 sps:$4 sm:$0xff]  }
  0xf2   : > { %1860 = vmatpush1.bf16.msra.mxu1 %v4708_v37  ;;  %1795 = vmatprep.subr.bf16.mxu0 %v4707_v38  ;;  %v4785_v37 = vld [vmem:[#allocation5 + $0x4a0] ss:$36 sps:$4 sm:$0xff]  }
  0xf3   : > { %1861 = vmatprep.subr.bf16.mxu1 %v4713_v39 }
  0xf5   : > { %1796 = vmatpush2.bf16.msra.mxu0 %v4705_v40 }
  0xf6   : > { %1862 = vmatpush1.bf16.msra.mxu1 %v4711_v41  ;;  %1888 = vmatprep.subr.bf16.mxu0 %v4716_v42 }
  0xf7   : > { %1863 = vmatprep.subr.bf16.mxu1 %v4719_v43 }
  0xf8   : > { %1798 = vmatmul.mubr.bf16.vlgmr.msra.gmra.mxu0 %v5236_v7 }
  0xf9   : > { %1889 = vmatpush1.bf16.msra.mxu0 %v4714_v44  ;;  %1920 = vmatprep.mubr.bf16.mxu0 %v5064_v0 }
  0xfa   : > { %1864 = vmatpush2.bf16.msra.mxu1 %v4717_v45  ;;  %1890 = vmatprep.subr.bf16.mxu0 %v4722_v46 }
  0xfb   : > { %1865 = vmatprep.subr.bf16.mxu1 %v4725_v47 }
  0xfd   : > { %1891 = vmatpush1.bf16.msra.mxu0 %v4720_v48 }
  0xfe   : > { %1866 = vmatpush2.bf16.msra.mxu1 %v4723_v49  ;;  %1892 = vmatprep.subr.bf16.mxu0 %v4728_v50 }
  0xff   : > { %1867 = vmatprep.subr.bf16.mxu1 %v4731_v51 }
 0x101   : > { %1893 = vmatpush1.bf16.msra.mxu0 %v4726_v53 }
 0x102   : > { %1868 = vmatpush2.bf16.msra.mxu1 %v4729_v54  ;;  %1894 = vmatprep.subr.bf16.mxu0 %v4734_v55 }
 0x103   : > { %1869 = vmatprep.subr.bf16.mxu1 %v4737_v56 }
 0x105   : > { %1895 = vmatpush1.bf16.msra.mxu0 %v4732_v57 }
 0x106   : > { %1870 = vmatpush2.bf16.msra.mxu1 %v4735_v58  ;;  %1896 = vmatprep.subr.bf16.mxu0 %v4740_v59 }
 0x107   : > { %1871 = vmatprep.subr.bf16.mxu1 %v4743_v60 }
 0x109   : > { %1897 = vmatpush1.bf16.msra.mxu0 %v4738_v61 }
 0x10a   : > { %1872 = vmatpush2.bf16.msra.mxu1 %v4741_v62  ;;  %1898 = vmatprep.subr.bf16.mxu0 %v4746_v63 }
 0x10b   : > { %1873 = vmatprep.subr.bf16.mxu1 %v4749_v1 }
 0x10d   : > { %1899 = vmatpush1.bf16.msra.mxu0 %v4744_v2 }
 0x10e   : > { %1874 = vmatpush2.bf16.msra.mxu1 %v4747_v3  ;;  %1900 = vmatprep.subr.bf16.mxu0 %v4752_v4 }
 0x10f   : > { %1875 = vmatprep.subr.bf16.mxu1 %v4755_v5 }
 0x111   : > { %1901 = vmatpush1.bf16.msra.mxu0 %v4750_v6 }
 0x112   : > { %1876 = vmatpush2.bf16.msra.mxu1 %v4753_v8  ;;  %1902 = vmatprep.subr.bf16.mxu0 %v4758_v9 }
 0x113   : > { %1877 = vmatprep.subr.bf16.mxu1 %v4761_v10 }
 0x115   : > { %1903 = vmatpush1.bf16.msra.mxu0 %v4756_v11 }
 0x116   : > { %1878 = vmatpush2.bf16.msra.mxu1 %v4759_v12  ;;  %4142 = vmatprep.subr.bf16.mxu0 %v4762_v13 }
 0x117   : > { %4227 = vmatprep.subr.bf16.mxu1 %v5065_v17 }
 0x118   : > { %1921 = vmatmul.mubr.bf16.vlgmr.msra.gmra.mxu0 %v4906_v18 }
 0x119   : > { %1880 = vmatmul.mubr.bf16.vlgmr.msra.gmra.mxu1 %v5236_v7  ;;  %4143 = vmatpush3.bf16.msra.mxu0 %v4763_v14 }
 0x11a   : > { %4228 = vmatpush3.bf16.msra.mxu1 %v4768_v15  ;;  %4144 = vmatprep.subr.bf16.mxu0 %v4764_v16 }
 0x11b   : > { %4229 = vmatprep.subr.bf16.mxu1 %v5065_v17  ;;  %1961 = vmatprep.mubr.bf16.mxu0 %v5232_v52  ;;  %v4773_v52 = vld [vmem:[#allocation5 + $0xf8] ss:$36 sps:$4 sm:$0xff]  }
 0x11c   : > { %4243 = vmatprep.mubr.msk.bf16.mxu1 %vm5066_vm0, %v5065_v17 }
 0x11d   : > { %4145 = vmatpush3.bf16.msra.mxu0 %v4765_v19 }
 0x11e   : > { %4230 = vmatpush3.bf16.msra.mxu1 %v4771_v20  ;;  %4146 = vmatprep.subr.bf16.mxu0 %v4766_v21 }
 0x11f   : > { %4231 = vmatprep.subr.bf16.mxu1 %v5065_v17 }
 0x121   : > { %4147 = vmatpush3.bf16.msra.mxu0 %v4767_v22 }
 0x122   : > { %4232 = vmatpush3.bf16.msra.mxu1 %v4774_v23  ;;  %4148 = vmatprep.subr.bf16.mxu0 %v4769_v24 }
 0x123   : > { %4233 = vmatprep.subr.bf16.mxu1 %v5065_v17 }
 0x125   : > { %4149 = vmatpush3.bf16.msra.mxu0 %v4770_v25 }
 0x126   : > { %4234 = vmatpush3.bf16.msra.mxu1 %v4777_v35  ;;  %4150 = vmatprep.subr.bf16.mxu0 %v4772_v26 }
 0x127   : > { %4235 = vmatprep.subr.bf16.mxu1 %v5065_v17 }
 0x129   : > { %4151 = vmatpush3.bf16.msra.mxu0 %v4773_v52 }
 0x12a   : > { %4236 = vmatpush3.bf16.msra.mxu1 %v4780_v27  ;;  %4152 = vmatprep.subr.bf16.mxu0 %v4775_v28 }
 0x12b   : > { %4237 = vmatprep.subr.bf16.mxu1 %v5065_v17 }
 0x12d   : > { %4153 = vmatpush3.bf16.msra.mxu0 %v4776_v29 }
 0x12e   : > { %4238 = vmatpush3.bf16.msra.mxu1 %v4783_v30  ;;  %4154 = vmatprep.subr.bf16.mxu0 %v4778_v31  ;;  %v2009_v30 = vlaneseq }
 0x12f   : > { %4239 = vmatprep.subr.bf16.mxu1 %v5065_v17 }
 0x130   : > { %v5288_v31 = vshrl.u32 %v2009_v30, 7 }
 0x131   : > { %4155 = vmatpush3.bf16.msra.mxu0 %v4779_v32  ;;  %v2012_v32 = vand.u32 127, %v2009_v30 }
 0x132   : > { %4240 = vmatpush3.bf16.msra.mxu1 %v4784_v33  ;;  %4156 = vmatprep.subr.bf16.mxu0 %v4781_v34  ;;  %v4866_v33 = vld [vmem:[#allocation7 + $0x228] ss:$12 sps:$4 sm:$0xff]  }
 0x133   : > { %4241 = vmatprep.subr.bf16.mxu1 %v5065_v17  ;;  %vm5291_vm3 = vcmp.ge.s32.totalorder %v5288_v31, %v2012_v32 }
 0x135   : > { %4157 = vmatpush3.bf16.msra.mxu0 %v4782_v36 }
 0x136   : > { %4242 = vmatpush3.bf16.msra.mxu1 %v4785_v37  ;;  %4247 = vmatprep.subr.bf16.mxu0 %v5065_v17 }
 0x137   : > { %4253 = vmatprep.subr.bf16.mxu1 %v5065_v17 }
 0x138   : > { %1962 = vmatmul.mubr.bf16.vlgmr.msra.gmra.mxu0 %v5236_v7 }
 0x139   : > { %v1676_v38 = vpop.f32.mrf.mxu1  ;;  %4244 = vmatmul.mubr.bf16.vlgmr.msra.gmra.mxu1 %v4906_v18  ;;  %4249 = vmatprep.mubr.msk.bf16.mxu0 %vm5066_vm0, %v5065_v17 }
 0x13a   : > { %4255 = vmatprep.mubr.msk.bf16.mxu1 %vm5066_vm0, %v5065_v17 }
 0x13b   : > { %v1678_v39 = vpop.f32.mrf.mxu1 }
 0x13d   : > { %v1680_v40 = vpop.f32.mrf.mxu1 }
 0x13f   : > { %v1681_v41 = vpop.f32.mrf.mxu1 }
 0x158   : > { %v1635_v42 = vpop.f32.mrf.mxu0 }
 0x159   : > { %v1677_v55 = vadd.f32 %v1676_v38, %v1635_v42 }
 0x15a   : > { %v1637_v43 = vpop.f32.mrf.mxu0 }
 0x15b   : > { %v5268_v44 = vadd.f32 %v1678_v39, %v1637_v43  ;;  %v2031_v60 = vpack.c.bf16 %v1677_v55, %v1677_v55  ;;  %v4796_v55 = vld [vmem:[#allocation7 + $0x1c] ss:$12 sps:$4 sm:$0xff]  }
 0x15c   : > { %v1639_v45 = vpop.f32.mrf.mxu0 }
 0x15e   : > { %v1640_v46 = vpop.f32.mrf.mxu0 }
 0x178   : > { %v1758_v48 = vpop.f32.mrf.mxu0 }
 0x179   : > { %v1717_v47 = vpop.f32.mrf.mxu1 }
 0x17a   : > { %v5270_v49 = vadd.f32 %v1758_v48, %v1717_v47  ;;  %v1760_v50 = vpop.f32.mrf.mxu0  ;;  %v4786_v48 = vld [vmem:[#allocation7 + $0x48] ss:$12 sps:$4 sm:$0xff]  }
 0x17b   : > { %v1719_v7 = vpop.f32.mrf.mxu1 }
 0x17c   : > { %v1761_v51 = vadd.f32 %v1760_v50, %v1719_v7  ;;  %v1762_v54 = vpop.f32.mrf.mxu0  ;;  %v4788_v7 = vld [vmem:[#allocation7 + $0x4c] ss:$12 sps:$4 sm:$0xff]   ;;  %v4789_v50 = vld [vmem:[#allocation7 + $0x50] ss:$12 sps:$4 sm:$0xff]  }
 0x17d   : > { %v1721_v53 = vpop.f32.mrf.mxu1  ;;  %v4790_v54 = vld [vmem:[#allocation7 + $0x30] ss:$12 sps:$4 sm:$0xff]  }
 0x17e   : > { %v2032_v56 = vpack.c.bf16 %v1761_v51, %v1761_v51  ;;  %v1763_v58 = vpop.f32.mrf.mxu0  ;;  %v4792_v51 = vld [vmem:[#allocation7 + $0x34] ss:$12 sps:$4 sm:$0xff]   ;;  %v4793_v53 = vld [vmem:[#allocation7 + $0x38] ss:$12 sps:$4 sm:$0xff]  }
 0x17f   : > { %v1722_v57 = vpop.f32.mrf.mxu1  ;;  %v4800_v58 = vld [vmem:[#allocation7 + $0x4] ss:$12 sps:$4 sm:$0xff]  }
 0x180   : > { %v2039_v59 = vsel %vm2034_vm1, %v2032_v56, 0  ;;  %2314 = vrot.lane.b32.xlu1 %v2032_v56, %s5067_s21  ;;  %v4797_v56 = vld [vmem:[#allocation7 + $0x20] ss:$12 sps:$4 sm:$0xff]   ;;  %v4794_v57 = vld [vmem:[#allocation7 + $0x18] ss:$12 sps:$4 sm:$0xff]  }
 0x181   : > { %4248 = vmatpush3.bf16.xpose.msra.mxu0 %v2039_v59  ;;  %v4798_v59 = vld [vmem:[#allocation7] ss:$12 sps:$4 sm:$0xff]  }
 0x182   : > { %2234 = vmatprep.subr.bf16.mxu0 %v4788_v7  ;;  %v4814_v7 = vld [vmem:[#allocation7 + $0x60] ss:$12 sps:$4 sm:$0xff]  }
 0x184   : > { %2311 = vrot.lane.b32.xlu1 %v2031_v60, %s5067_s21 }
 0x188   : > { %4250 = vmatmul.mubr.msk.bf16.vlgmr.msra.gmra.mxu0 %vm2034_vm1, %v2031_v60  ;;  %v4801_v60 = vld [vmem:[#allocation7 + $0x8] ss:$12 sps:$4 sm:$0xff]  }
 0x189   : > { %2258 = vmatprep.mubr.bf16.mxu0 %v5064_v0  ;;  %2235 = vmatpush1.bf16.msra.mxu0 %v4786_v48  ;;  %v4816_v48 = vld [vmem:[#allocation7 + $0x64] ss:$12 sps:$4 sm:$0xff]  }
 0x18a   : > { %2236 = vmatprep.subr.bf16.mxu0 %v4792_v51 }
 0x18d   : > { %2237 = vmatpush1.bf16.msra.mxu0 %v4790_v54 }
 0x18e   : > { %2238 = vmatprep.subr.bf16.mxu0 %v4796_v55 }
 0x191   : > { %2239 = vmatpush1.bf16.msra.mxu0 %v4794_v57 }
 0x192   : > { %2240 = vmatprep.subr.bf16.mxu0 %v4800_v58 }
 0x195   : > { %2241 = vmatpush1.bf16.msra.mxu0 %v4798_v59 }
 0x196   : > { %4271 = vmatprep.subr.bf16.mxu0 %v5065_v17 }
 0x199   : > { %v1840_v61 = vpop.f32.mrf.mxu1 }
 0x19b   : > { %v1842_v62 = vpop.f32.mrf.mxu1 }
 0x19d   : > { %v1844_v63 = vpop.f32.mrf.mxu1 }
 0x19f   : > { %v1845_v1 = vpop.f32.mrf.mxu1 }
 0x1b8   : > { %v1799_v2 = vpop.f32.mrf.mxu0 }
 0x1b9   : > { %v5277_v3 = vadd.f32 %v1840_v61, %v1799_v2 }
 0x1ba   : > { %v1801_v4 = vpop.f32.mrf.mxu0 }
 0x1bb   : > { %v5279_v5 = vadd.f32 %v1842_v62, %v1801_v4  ;;  %v5338_v55 = vpack.c.bf16 %v5277_v3, %v5277_v3 }
 0x1bc   : > { %v1803_v6 = vpop.f32.mrf.mxu0 }
 0x1be   : > { %v1804_v8 = vpop.f32.mrf.mxu0 }
 0x1d8   : > { %v1922_v9 = vpop.f32.mrf.mxu0 }
 0x1d9   : > { %v1881_v10 = vpop.f32.mrf.mxu1 }
 0x1da   : > { %v1923_v11 = vadd.f32 %v1922_v9, %v1881_v10  ;;  %v1924_v12 = vpop.f32.mrf.mxu0 }
 0x1db   : > { %v1883_v13 = vpop.f32.mrf.mxu1 }
 0x1dc   : > { %v2033_v14 = vpack.c.bf16 %v1923_v11, %v1923_v11  ;;  %v5281_v15 = vadd.f32 %v1924_v12, %v1883_v13  ;;  %v1926_v16 = vpop.f32.mrf.mxu0 }
 0x1dd   : > { %v1885_v18 = vpop.f32.mrf.mxu1 }
 0x1de   : > { %v2098_v19 = vsel %vm2096_vm2, %v2033_v14, 0  ;;  %2374 = vrot.lane.b32.xlu1 %v2033_v14, %s5067_s21  ;;  %v1927_v20 = vpop.f32.mrf.mxu0 }
 0x1df   : > { %4254 = vmatpush3.bf16.msra.mxu1 %v2098_v19  ;;  %v1886_v21 = vpop.f32.mrf.mxu1 }
 0x1e0   : > { %4259 = vmatprep.subr.bf16.mxu1 %v5065_v17 }
 0x1f2   : > { %v2315_v62 = vpop.permute.xlu1 %2314 }
 0x1f3   : > { %v2320_v11 = vsel %vm2034_vm1, %v2315_v62, 0 }
 0x1f6   : > { %v2312_v63 = vpop.permute.xlu1 %2311 }
 0x1f8   : > { %v4158_v22 = vpop.f32.mrf.mxu0 }
 0x1f9   : > { %v2003_v23 = vpop.f32.mrf.mxu1 }
 0x1fa   : > { %v4159_v24 = vpop.f32.mrf.mxu0 }
 0x1fb   : > { %v4245_v25 = vpop.f32.mrf.mxu1  ;;  %v4160_v35 = vadd.f32 %v4159_v24, %v4158_v22 }
 0x1fc   : > { %v4161_v26 = vpop.f32.mrf.mxu0 }
 0x1fd   : > { %v2006_v52 = vpop.f32.mrf.mxu1  ;;  %v5286_v27 = vadd.f32 %v4160_v35, %v2003_v23 }
 0x1fe   : > { %v4162_v28 = vpop.f32.mrf.mxu0 }
 0x1ff   : > { %v4246_v29 = vpop.f32.mrf.mxu1 }
 0x248   : > { %v2075_v34 = vpop.f32.mrf.mxu0 }
 0x249   : > { %v2081_v36 = vsel %vm5291_vm3, %v2075_v34, -1e+30 }
 0x24a   : > { %v4251_v37 = vpop.f32.mrf.mxu0  ;;  %v2083_v38 = vsel %vm2082_vm4, %v2081_v36, -inf }
 0x24b   : > { %2084 = vmax.xlane.f32.xlu0 %v2083_v38  ;;  %v4802_v38 = vld [vmem:[#allocation7 + $0xa8] ss:$12 sps:$4 sm:$0xff]  }
 0x24c   : > { %v2078_v39 = vpop.f32.mrf.mxu0 }
 0x24d   : > { %v4804_v39 = vld [vmem:[#allocation7 + $0xac] ss:$12 sps:$4 sm:$0xff]  }
 0x24e   : > { %v4252_v40 = vpop.f32.mrf.mxu0 }
 0x24f   : > { %v4805_v40 = vld [vmem:[#allocation7 + $0xb0] ss:$12 sps:$4 sm:$0xff]  }
 0x250   : > { %v2375_v6 = vpop.permute.xlu1 %2374 }
 0x251   : > { %v2380_v12 = vsel %vm2096_vm2, %v2375_v6, 0 }
 0x2d4   : > { %v2085_v41 = vpop.xlane.xlu0 %2084 }
 0x2d5   : > { %v2086_v42 = vsub.f32 %v2081_v36, %v2085_v41  ;;  %v4808_v41 = vld [vmem:[#allocation7 + $0x94] ss:$12 sps:$4 sm:$0xff]  }
 0x2d7   : > { %v2087_v43 = vmul.f32 1.442695, %v2086_v42  ;;  %v4809_v42 = vld [vmem:[#allocation7 + $0x98] ss:$12 sps:$4 sm:$0xff]  }
 0x2d9   : > { %4882 = vpow2.f32 %v2087_v43  ;;  %v4806_v43 = vld [vmem:[#allocation7 + $0x90] ss:$12 sps:$4 sm:$0xff]  }
 0x2e6   : > { %v4883_v45 = vpop.eup %4882 }
 0x2e7   : > { %v2089_v46 = vsel %vm2082_vm4, %v4883_v45, 0.0  ;;  %v2092_v47 = vpack.c.bf16 %v4883_v45, %v4883_v45  ;;  %v4812_v45 = vld [vmem:[#allocation7 + $0x7c] ss:$12 sps:$4 sm:$0xff]  }
 0x2e8   : > { %2090 = vadd.xlane.f32.xlu0 %v2089_v46  ;;  %v4813_v46 = vld [vmem:[#allocation7 + $0x80] ss:$12 sps:$4 sm:$0xff]  }
 0x2e9   : > { %4256 = vmatmul.mubr.msk.bf16.vlgmr.msra.gmra.mxu1 %vm2082_vm4, %v2092_v47  ;;  %v4810_v47 = vld [vmem:[#allocation7 + $0x78] ss:$12 sps:$4 sm:$0xff]  }
 0x2ea   : > { %4267 = vmatprep.mubr.msk.bf16.mxu1 %vm5066_vm0, %v5065_v17  ;;  %4260 = vmatpush3.bf16.msra.mxu1 %v4789_v50  ;;  %v4817_v50 = vld [vmem:[#allocation7 + $0x68] ss:$12 sps:$4 sm:$0xff]  }
 0x2eb   : > { %4261 = vmatprep.subr.bf16.mxu1 %v5065_v17 }
 0x2ee   : > { %4262 = vmatpush3.bf16.msra.mxu1 %v4793_v53 }
 0x2ef   : > { %4263 = vmatprep.subr.bf16.mxu1 %v5065_v17 }
 0x2f2   : > { %4264 = vmatpush3.bf16.msra.mxu1 %v4797_v56  ;;  %v2594_v56 = vpack.c.bf16 %v5281_v15, %v5281_v15  ;;  %v2592_v15 = vpack.c.bf16 %v5268_v44, %v5268_v44 }
 0x2f3   : > { %4265 = vmatprep.subr.bf16.mxu1 %v5065_v17 }
 0x2f4   : > { %v2656_v62 = vsel %vm2096_vm2, %v2594_v56, 0 }
 0x2f6   : > { %4266 = vmatpush3.bf16.msra.mxu1 %v4801_v60 }
 0x2f7   : > { %4277 = vmatprep.subr.bf16.mxu1 %v5065_v17 }
 0x371   : > { %v2091_v61 = vpop.xlane.xlu0 %2090 }
 0x372   : > { %4884 = vrcp.f32 %v2091_v61  ;;  %v2599_v61 = vsel %vm2034_vm1, %v5338_v55, 0 }
 0x37f   : > { %v4885_v1 = vpop.eup %4884 }
 0x3a9   : > { %v2134_v2 = vpop.f32.mrf.mxu1 }
 0x3aa   : > { %v2141_v4 = vmul.f32 %v4885_v1, %v2134_v2  ;;  %v2026_v1 = vsub.s32 2, %v5288_v31  ;;  %v2014_v2 = vld [vmem:[%s5546_s3] sm:$0x7] }
 0x3ab   : > { %v4257_v8 = vpop.f32.mrf.mxu1 }
 0x3ac   : > { %v2142_v9 = vpack.c.bf16 %v2141_v4, %v2141_v4  ;;  %v2022_v4 = vsub.s32 1, %v5288_v31  ;;  %v2027_v8 = vrot.slane %v2014_v2, %v2026_v1 }
 0x3ad   : > { %v2137_v10 = vpop.f32.mrf.mxu1 }
 0x3ae   : > { %4057 = vmatmul.mubr.msk.bf16.vlgmr.msra.gmra.mxu0 %vm2034_vm1, %v2142_v9  ;;  %4268 = vmatmul.mubr.msk.bf16.vlgmr.msra.gmra.mxu1 %vm2034_vm1, %v2142_v9  ;;  %v2023_v9 = vrot.slane %v2014_v2, %v2022_v4 }
 0x3af   : > { %4272 = vmatpush3.bf16.xpose.msra.mxu0 %v2320_v11  ;;  %4278 = vmatpush3.bf16.msra.mxu1 %v2380_v12  ;;  %v4258_v13 = vpop.f32.mrf.mxu1 }
 0x3b0   : > { %4273 = vmatprep.mubr.msk.bf16.mxu0 %vm5066_vm0, %v5065_v17  ;;  %4279 = vmatprep.mubr.msk.bf16.mxu1 %vm5066_vm0, %v5065_v17 }
 0x3b1   : > { %4283 = vmatprep.subr.bf16.mxu1 %v5065_v17  ;;  %2516 = vmatprep.subr.bf16.mxu0 %v4804_v39  ;;  %v4820_v39 = vld [vmem:[#allocation7 + $0x10c] ss:$12 sps:$4 sm:$0xff]  }
 0x3b6   : > { %4274 = vmatmul.mubr.msk.bf16.vlgmr.msra.gmra.mxu0 %vm2034_vm1, %v2312_v63  ;;  %v2018_v63 = vsub.s32 0, %v5288_v31 }
 0x3b7   : > { %2540 = vmatprep.mubr.bf16.mxu0 %v5064_v0  ;;  %2517 = vmatpush1.bf16.msra.mxu0 %v4802_v38  ;;  %v4818_v38 = vld [vmem:[#allocation7 + $0x108] ss:$12 sps:$4 sm:$0xff]  }
 0x3b8   : > { %2518 = vmatprep.subr.bf16.mxu0 %v4808_v41  ;;  %v2019_v6 = vrot.slane %v2014_v2, %v2018_v63  ;;  %v4824_v41 = vld [vmem:[#allocation7 + $0xf4] ss:$12 sps:$4 sm:$0xff]  }
 0x3bb   : > { %2519 = vmatpush1.bf16.msra.mxu0 %v4806_v43  ;;  %v4822_v43 = vld [vmem:[#allocation7 + $0xf0] ss:$12 sps:$4 sm:$0xff]  }
 0x3bc   : > { %2520 = vmatprep.subr.bf16.mxu0 %v4812_v45  ;;  %v4828_v45 = vld [vmem:[#allocation7 + $0xdc] ss:$12 sps:$4 sm:$0xff]  }
 0x3bf   : > { %2521 = vmatpush1.bf16.msra.mxu0 %v4810_v47  ;;  %v4826_v47 = vld [vmem:[#allocation7 + $0xd8] ss:$12 sps:$4 sm:$0xff]  }
 0x3c0   : > { %2522 = vmatprep.subr.bf16.mxu0 %v4816_v48  ;;  %v4832_v48 = vld [vmem:[#allocation7 + $0xc4] ss:$12 sps:$4 sm:$0xff]  }
 0x3c3   : > { %2523 = vmatpush1.bf16.msra.mxu0 %v4814_v7  ;;  %v4830_v7 = vld [vmem:[#allocation7 + $0xc0] ss:$12 sps:$4 sm:$0xff]  }
 0x3c4   : > { %4295 = vmatprep.subr.bf16.mxu0 %v5065_v17 }
 0x46e   : > { %v5318_v14 = vpop.f32.mrf.mxu0  ;;  %v5320_v16 = vpop.f32.mrf.mxu1 }
 0x46f   : > { %v2307_v10 = vadd.f32 %v5318_v14, %v2019_v6  ;;  %v2309_v44 = vadd.f32 %v5320_v16, %v2027_v8 }
 0x470   : > { %v5322_v18 = vpop.f32.mrf.mxu0  ;;  %v4269_v19 = vpop.f32.mrf.mxu1 }
 0x471   : > { %v2308_v13 = vadd.f32 %v5322_v18, %v2023_v9 }
 0x472   : > { %v2264_v20 = vpop.f32.mrf.mxu0  ;;  %v2304_v21 = vpop.f32.mrf.mxu1 }
 0x474   : > { %v2265_v22 = vpop.f32.mrf.mxu0  ;;  %v4270_v23 = vpop.f32.mrf.mxu1 }
 0x476   : > { %v2356_v24 = vpop.f32.mrf.mxu0 }
 0x477   : > { %v2362_v25 = vsel %vm5291_vm3, %v2356_v24, -1e+30 }
 0x478   : > { %v4275_v35 = vpop.f32.mrf.mxu0  ;;  %v2363_v26 = vsel %vm2082_vm4, %v2362_v25, -inf }
 0x479   : > { %2364 = vmax.xlane.f32.xlu0 %v2363_v26 }
 0x47a   : > { %v2359_v52 = vpop.f32.mrf.mxu0 }
 0x47c   : > { %v4276_v28 = vpop.f32.mrf.mxu0 }
 0x502   : > { %v2365_v29 = vpop.xlane.xlu0 %2364 }
 0x503   : > { %v2366_v30 = vsub.f32 %v2362_v25, %v2365_v29 }
 0x505   : > { %v2367_v32 = vmul.f32 1.442695, %v2366_v30 }
 0x507   : > { %4886 = vpow2.f32 %v2367_v32 }
 0x514   : > { %v4887_v34 = vpop.eup %4886 }
 0x515   : > { %v2369_v36 = vsel %vm2082_vm4, %v4887_v34, 0.0  ;;  %v2372_v37 = vpack.c.bf16 %v4887_v34, %v4887_v34 }
 0x516   : > { %2370 = vadd.xlane.f32.xlu0 %v2369_v36 }
 0x517   : > { %4280 = vmatmul.mubr.msk.bf16.vlgmr.msra.gmra.mxu1 %vm2082_vm4, %v2372_v37 }
 0x518   : > { %4291 = vmatprep.mubr.msk.bf16.mxu1 %vm5066_vm0, %v5065_v17  ;;  %4284 = vmatpush3.bf16.msra.mxu1 %v4805_v40  ;;  %v4821_v40 = vld [vmem:[#allocation7 + $0x110] ss:$12 sps:$4 sm:$0xff]  }
 0x519   : > { %4285 = vmatprep.subr.bf16.mxu1 %v5065_v17 }
 0x51c   : > { %4286 = vmatpush3.bf16.msra.mxu1 %v4809_v42  ;;  %v4825_v42 = vld [vmem:[#allocation7 + $0xf8] ss:$12 sps:$4 sm:$0xff]  }
 0x51d   : > { %4287 = vmatprep.subr.bf16.mxu1 %v5065_v17 }
 0x520   : > { %4288 = vmatpush3.bf16.msra.mxu1 %v4813_v46  ;;  %v4829_v46 = vld [vmem:[#allocation7 + $0xe0] ss:$12 sps:$4 sm:$0xff]  }
 0x521   : > { %4289 = vmatprep.subr.bf16.mxu1 %v5065_v17 }
 0x524   : > { %4290 = vmatpush3.bf16.msra.mxu1 %v4817_v50  ;;  %v4833_v50 = vld [vmem:[#allocation7 + $0xc8] ss:$12 sps:$4 sm:$0xff]  }
 0x525   : > { %4301 = vmatprep.subr.bf16.mxu1 %v5065_v17 }
 0x59f   : > { %v2371_v51 = vpop.xlane.xlu0 %2370 }
 0x5a0   : > { %4888 = vrcp.f32 %v2371_v51 }
 0x5ad   : > { %v4889_v53 = vpop.eup %4888 }
 0x5d7   : > { %v2416_v54 = vpop.f32.mrf.mxu1 }
 0x5d8   : > { %v2423_v57 = vmul.f32 %v4889_v53, %v2416_v54 }
 0x5d9   : > { %v4281_v58 = vpop.f32.mrf.mxu1 }
 0x5da   : > { %v2424_v59 = vpack.c.bf16 %v2423_v57, %v2423_v57 }
 0x5db   : > { %v2419_v60 = vpop.f32.mrf.mxu1 }
 0x5dc   : > { %4073 = vmatmul.mubr.msk.bf16.vlgmr.msra.gmra.mxu0 %vm2034_vm1, %v2424_v59  ;;  %4292 = vmatmul.mubr.msk.bf16.vlgmr.msra.gmra.mxu1 %vm2034_vm1, %v2424_v59 }
 0x5dd   : > { %4296 = vmatpush3.bf16.xpose.msra.mxu0 %v2599_v61  ;;  %4302 = vmatpush3.bf16.msra.mxu1 %v2656_v62  ;;  %v4282_v3 = vpop.f32.mrf.mxu1 }
 0x5de   : > { %4297 = vmatprep.mubr.msk.bf16.mxu0 %vm5066_vm0, %v5065_v17  ;;  %4303 = vmatprep.mubr.msk.bf16.mxu1 %vm5066_vm0, %v5065_v17 }
 0x5df   : > { %4307 = vmatprep.subr.bf16.mxu1 %v5065_v17  ;;  %2792 = vmatprep.subr.bf16.mxu0 %v4820_v39  ;;  %v4849_v39 = vld [vmem:[#allocation7 + $0x128] ss:$12 sps:$4 sm:$0xff]  }
 0x5e4   : > { %4298 = vmatmul.mubr.msk.bf16.vlgmr.msra.gmra.mxu0 %vm2034_vm1, %v2592_v15 }
 0x5e5   : > { %2816 = vmatprep.mubr.bf16.mxu0 %v5064_v0  ;;  %2793 = vmatpush1.bf16.msra.mxu0 %v4818_v38  ;;  %v4846_v38 = vld [vmem:[#allocation7 + $0x120] ss:$12 sps:$4 sm:$0xff]  }
 0x5e6   : > { %2794 = vmatprep.subr.bf16.mxu0 %v4824_v41 }
 0x5e9   : > { %2795 = vmatpush1.bf16.msra.mxu0 %v4822_v43  ;;  %v3151_v43 = vpack.c.bf16 %v5279_v5, %v5279_v5 }
 0x5ea   : > { %2796 = vmatprep.subr.bf16.mxu0 %v4828_v45 }
 0x5ed   : > { %2797 = vmatpush1.bf16.msra.mxu0 %v4826_v47 }
 0x5ee   : > { %2798 = vmatprep.subr.bf16.mxu0 %v4832_v48 }
 0x5f1   : > { %2799 = vmatpush1.bf16.msra.mxu0 %v4830_v7  ;;  %v3157_v7 = vsel %vm2034_vm1, %v3151_v43, 0 }
 0x5f2   : > { %4319 = vmatprep.subr.bf16.mxu0 %v5065_v17 }
 0x69c   : > { %v2542_v11 = vpop.f32.mrf.mxu0  ;;  %v2583_v12 = vpop.f32.mrf.mxu1 }
 0x69d   : > { %v5365_v19 = vadd.f32 %v2542_v11, %v2307_v10  ;;  %v5367_v20 = vadd.f32 %v2583_v12, %v2309_v44 }
 0x69e   : > { %v2544_v21 = vpop.f32.mrf.mxu0  ;;  %v4293_v22 = vpop.f32.mrf.mxu1 }
 0x69f   : > { %v5369_v23 = vadd.f32 %v2544_v21, %v2308_v13 }
 0x6a0   : > { %v2546_v31 = vpop.f32.mrf.mxu0  ;;  %v2586_v24 = vpop.f32.mrf.mxu1 }
 0x6a2   : > { %v2547_v25 = vpop.f32.mrf.mxu0  ;;  %v4294_v35 = vpop.f32.mrf.mxu1 }
 0x6a4   : > { %v2635_v26 = vpop.f32.mrf.mxu0 }
 0x6a5   : > { %v2641_v14 = vsel %vm5291_vm3, %v2635_v26, -1e+30 }
 0x6a6   : > { %v4299_v16 = vpop.f32.mrf.mxu0  ;;  %v2642_v52 = vsel %vm2082_vm4, %v2641_v14, -inf }
 0x6a7   : > { %2643 = vmax.xlane.f32.xlu1 %v2642_v52  ;;  %v3150_v16 = vpack.c.bf16 %v5270_v49, %v5270_v49  ;;  %v4834_v52 = vld [vmem:[#allocation7 + $0x168] ss:$12 sps:$4 sm:$0xff]  }
 0x6a8   : > { %v2638_v18 = vpop.f32.mrf.mxu0  ;;  %v4844_v49 = vld [vmem:[#allocation7 + $0x13c] ss:$12 sps:$4 sm:$0xff]  }
 0x6a9   : > { %v4836_v18 = vld [vmem:[#allocation7 + $0x16c] ss:$12 sps:$4 sm:$0xff]  }
 0x6aa   : > { %v4300_v28 = vpop.f32.mrf.mxu0 }
 0x6ab   : > { %v4837_v28 = vld [vmem:[#allocation7 + $0x170] ss:$12 sps:$4 sm:$0xff]  }
 0x6b8   : > { %2932 = vrot.lane.b32.xlu1 %v2594_v56, %s5067_s21 }
 0x730   : > { %v2644_v29 = vpop.xlane.xlu1 %2643 }
 0x731   : > { %v2645_v30 = vsub.f32 %v2641_v14, %v2644_v29  ;;  %v3152_v29 = vpack.c.bf16 %v5286_v27, %v5286_v27  ;;  %v4848_v27 = vld [vmem:[#allocation7 + $0x124] ss:$12 sps:$4 sm:$0xff]  }
 0x733   : > { %v2646_v32 = vmul.f32 1.442695, %v2645_v30  ;;  %v4840_v30 = vld [vmem:[#allocation7 + $0x154] ss:$12 sps:$4 sm:$0xff]  }
 0x735   : > { %4890 = vpow2.f32 %v2646_v32  ;;  %v4841_v32 = vld [vmem:[#allocation7 + $0x158] ss:$12 sps:$4 sm:$0xff]  }
 0x742   : > { %v4891_v34 = vpop.eup %4890 }
 0x743   : > { %v2648_v36 = vsel %vm2082_vm4, %v4891_v34, 0.0  ;;  %v2651_v37 = vpack.c.bf16 %v4891_v34, %v4891_v34  ;;  %v4838_v34 = vld [vmem:[#allocation7 + $0x150] ss:$12 sps:$4 sm:$0xff]  }
 0x744   : > { %2649 = vadd.xlane.f32.xlu0 %v2648_v36  ;;  %v4845_v36 = vld [vmem:[#allocation7 + $0x140] ss:$12 sps:$4 sm:$0xff]  }
 0x745   : > { %4304 = vmatmul.mubr.msk.bf16.vlgmr.msra.gmra.mxu1 %vm2082_vm4, %v2651_v37  ;;  %v4842_v37 = vld [vmem:[#allocation7 + $0x138] ss:$12 sps:$4 sm:$0xff]  }
 0x746   : > { %4315 = vmatprep.mubr.msk.bf16.mxu1 %vm5066_vm0, %v5065_v17  ;;  %4308 = vmatpush3.bf16.msra.mxu1 %v4821_v40 }
 0x747   : > { %4309 = vmatprep.subr.bf16.mxu1 %v5065_v17 }
 0x74a   : > { %4310 = vmatpush3.bf16.msra.mxu1 %v4825_v42 }
 0x74b   : > { %4311 = vmatprep.subr.bf16.mxu1 %v5065_v17 }
 0x74e   : > { %4312 = vmatpush3.bf16.msra.mxu1 %v4829_v46 }
 0x74f   : > { %4313 = vmatprep.subr.bf16.mxu1 %v5065_v17 }
 0x752   : > { %4314 = vmatpush3.bf16.msra.mxu1 %v4833_v50  ;;  %v3214_v50 = vsel %vm2096_vm2, %v3152_v29, 0 }
 0x753   : > { %4325 = vmatprep.subr.bf16.mxu1 %v5065_v17 }
 0x75a   : > { %2872 = vrot.lane.b32.xlu0 %v5338_v55, %s5067_s21  ;;  %v2933_v55 = vpop.permute.xlu1 %2932 }
 0x75b   : > { %v2938_v61 = vsel %vm2096_vm2, %v2933_v55, 0 }
 0x75e   : > { %2869 = vrot.lane.b32.xlu0 %v2592_v15, %s5067_s21 }
 0x7cd   : > { %v2650_v51 = vpop.xlane.xlu0 %2649 }
 0x7ce   : > { %4892 = vrcp.f32 %v2650_v51 }
 0x7d1   : > { %v2873_v57 = vpop.permute.xlu0 %2872 }
 0x7d2   : > { %v2878_v62 = vsel %vm2034_vm1, %v2873_v57, 0 }
 0x7d5   : > { %v2870_v15 = vpop.permute.xlu0 %2869 }
 0x7db   : > { %v4893_v53 = vpop.eup %4892 }
 0x805   : > { %v2692_v54 = vpop.f32.mrf.mxu1 }
 0x806   : > { %v2699_v56 = vmul.f32 %v4893_v53, %v2692_v54 }
 0x807   : > { %v4305_v58 = vpop.f32.mrf.mxu1 }
 0x808   : > { %v2700_v59 = vpack.c.bf16 %v2699_v56, %v2699_v56 }
 0x809   : > { %v2695_v60 = vpop.f32.mrf.mxu1 }
 0x80a   : > { %4089 = vmatmul.mubr.msk.bf16.vlgmr.msra.gmra.mxu0 %vm2034_vm1, %v2700_v59  ;;  %4316 = vmatmul.mubr.msk.bf16.vlgmr.msra.gmra.mxu1 %vm2034_vm1, %v2700_v59 }
 0x80b   : > { %4320 = vmatpush3.bf16.xpose.msra.mxu0 %v2878_v62  ;;  %4326 = vmatpush3.bf16.msra.mxu1 %v2938_v61  ;;  %v4306_v3 = vpop.f32.mrf.mxu1 }
 0x80c   : > { %4321 = vmatprep.mubr.msk.bf16.mxu0 %vm5066_vm0, %v5065_v17  ;;  %4327 = vmatprep.mubr.msk.bf16.mxu1 %vm5066_vm0, %v5065_v17 }
 0x80d   : > { %4331 = vmatprep.subr.bf16.mxu1 %v5065_v17  ;;  %3074 = vmatprep.subr.bf16.mxu0 %v4836_v18 }
 0x812   : > { %4322 = vmatmul.mubr.msk.bf16.vlgmr.msra.gmra.mxu0 %vm2034_vm1, %v2870_v15 }
 0x813   : > { %3098 = vmatprep.mubr.bf16.mxu0 %v5064_v0  ;;  %3075 = vmatpush1.bf16.msra.mxu0 %v4834_v52 }
 0x814   : > { %3076 = vmatprep.subr.bf16.mxu0 %v4840_v30 }
 0x817   : > { %3077 = vmatpush1.bf16.msra.mxu0 %v4838_v34 }
 0x818   : > { %3078 = vmatprep.subr.bf16.mxu0 %v4844_v49 }
 0x81b   : > { %3079 = vmatpush1.bf16.msra.mxu0 %v4842_v37 }
 0x81c   : > { %3080 = vmatprep.subr.bf16.mxu0 %v4848_v27 }
 0x81f   : > { %3081 = vmatpush1.bf16.msra.mxu0 %v4846_v38 }
 0x820   : > { %4343 = vmatprep.subr.bf16.mxu0 %v5065_v17 }
 0x8ca   : > { %v2818_v63 = vpop.f32.mrf.mxu0  ;;  %v2859_v1 = vpop.f32.mrf.mxu1 }
 0x8cb   : > { %v5399_v2 = vadd.f32 %v2818_v63, %v5365_v19  ;;  %v5402_v4 = vadd.f32 %v2859_v1, %v5367_v20 }
 0x8cc   : > { %v2820_v6 = vpop.f32.mrf.mxu0  ;;  %v4317_v8 = vpop.f32.mrf.mxu1 }
 0x8cd   : > { %v5405_v9 = vadd.f32 %v2820_v6, %v5369_v23 }
 0x8ce   : > { %v2822_v10 = vpop.f32.mrf.mxu0  ;;  %v2862_v44 = vpop.f32.mrf.mxu1 }
 0x8d0   : > { %v2823_v11 = vpop.f32.mrf.mxu0  ;;  %v4318_v12 = vpop.f32.mrf.mxu1 }
 0x8d1   : > { %v4850_v12 = vld [vmem:[#allocation7 + $0x1c8] ss:$12 sps:$4 sm:$0xff]  }
 0x8d2   : > { %v2914_v13 = vpop.f32.mrf.mxu0 }
 0x8d3   : > { %v2920_v21 = vsel %vm5291_vm3, %v2914_v13, -1e+30  ;;  %v4852_v13 = vld [vmem:[#allocation7 + $0x1cc] ss:$12 sps:$4 sm:$0xff]  }
 0x8d4   : > { %v4323_v22 = vpop.f32.mrf.mxu0  ;;  %v2921_v19 = vsel %vm2082_vm4, %v2920_v21, -inf }
 0x8d5   : > { %2922 = vmax.xlane.f32.xlu0 %v2921_v19  ;;  %v4856_v22 = vld [vmem:[#allocation7 + $0x1b4] ss:$12 sps:$4 sm:$0xff]   ;;  %v4857_v19 = vld [vmem:[#allocation7 + $0x1b8] ss:$12 sps:$4 sm:$0xff]  }
 0x8d6   : > { %v2917_v31 = vpop.f32.mrf.mxu0 }
 0x8d7   : > { %v4854_v31 = vld [vmem:[#allocation7 + $0x1b0] ss:$12 sps:$4 sm:$0xff]  }
 0x8d8   : > { %v4324_v20 = vpop.f32.mrf.mxu0 }
 0x8d9   : > { %v4860_v20 = vld [vmem:[#allocation7 + $0x19c] ss:$12 sps:$4 sm:$0xff]  }
 0x95e   : > { %v2923_v24 = vpop.xlane.xlu0 %2922 }
 0x95f   : > { %v2924_v25 = vsub.f32 %v2920_v21, %v2923_v24  ;;  %v4853_v21 = vld [vmem:[#allocation7 + $0x1d0] ss:$12 sps:$4 sm:$0xff]   ;;  %v4861_v24 = vld [vmem:[#allocation7 + $0x1a0] ss:$12 sps:$4 sm:$0xff]  }
 0x961   : > { %v2925_v35 = vmul.f32 1.442695, %v2924_v25  ;;  %v4858_v25 = vld [vmem:[#allocation7 + $0x198] ss:$12 sps:$4 sm:$0xff]  }
 0x963   : > { %4894 = vpow2.f32 %v2925_v35  ;;  %v4864_v35 = vld [vmem:[#allocation7 + $0x184] ss:$12 sps:$4 sm:$0xff]  }
 0x970   : > { %v4895_v23 = vpop.eup %4894 }
 0x971   : > { %v2927_v26 = vsel %vm2082_vm4, %v4895_v23, 0.0  ;;  %v2930_v14 = vpack.c.bf16 %v4895_v23, %v4895_v23  ;;  %v4862_v23 = vld [vmem:[#allocation7 + $0x180] ss:$12 sps:$4 sm:$0xff]  }
 0x972   : > { %2928 = vadd.xlane.f32.xlu1 %v2927_v26  ;;  %v4865_v26 = vld [vmem:[#allocation7 + $0x188] ss:$12 sps:$4 sm:$0xff]  }
 0x973   : > { %4328 = vmatmul.mubr.msk.bf16.vlgmr.msra.gmra.mxu1 %vm2082_vm4, %v2930_v14 }
 0x974   : > { %4339 = vmatprep.mubr.msk.bf16.mxu1 %vm5066_vm0, %v5065_v17  ;;  %4332 = vmatpush3.bf16.msra.mxu1 %v4837_v28 }
 0x975   : > { %4333 = vmatprep.subr.bf16.mxu1 %v5065_v17 }
 0x978   : > { %4334 = vmatpush3.bf16.msra.mxu1 %v4841_v32 }
 0x979   : > { %4335 = vmatprep.subr.bf16.mxu1 %v5065_v17 }
 0x97c   : > { %4336 = vmatpush3.bf16.msra.mxu1 %v4845_v36 }
 0x97d   : > { %4337 = vmatprep.subr.bf16.mxu1 %v5065_v17 }
 0x980   : > { %4338 = vmatpush3.bf16.msra.mxu1 %v4849_v39 }
 0x981   : > { %4349 = vmatprep.subr.bf16.mxu1 %v5065_v17 }
 0x983   : > { %3427 = vrot.lane.b32.xlu1 %v3150_v16, %s5067_s21 }
 0x987   : > { %3490 = vrot.lane.b32.xlu1 %v3152_v29, %s5067_s21 }
 0x9fb   : > { %v2929_v40 = vpop.xlane.xlu1 %2928 }
 0x9fc   : > { %4896 = vrcp.f32 %v2929_v40 }
 0xa09   : > { %v4897_v41 = vpop.eup %4896 }
 0xa33   : > { %v2974_v42 = vpop.f32.mrf.mxu1 }
 0xa34   : > { %v2981_v45 = vmul.f32 %v4897_v41, %v2974_v42 }
 0xa35   : > { %v4329_v46 = vpop.f32.mrf.mxu1 }
 0xa36   : > { %v2982_v47 = vpack.c.bf16 %v2981_v45, %v2981_v45 }
 0xa37   : > { %v2977_v48 = vpop.f32.mrf.mxu1 }
 0xa38   : > { %4105 = vmatmul.mubr.msk.bf16.vlgmr.msra.gmra.mxu0 %vm2034_vm1, %v2982_v47  ;;  %4340 = vmatmul.mubr.msk.bf16.vlgmr.msra.gmra.mxu1 %vm2034_vm1, %v2982_v47 }
 0xa39   : > { %4344 = vmatpush3.bf16.xpose.msra.mxu0 %v3157_v7  ;;  %4350 = vmatpush3.bf16.msra.mxu1 %v3214_v50  ;;  %v4330_v51 = vpop.f32.mrf.mxu1 }
 0xa3a   : > { %4345 = vmatprep.mubr.msk.bf16.mxu0 %vm5066_vm0, %v5065_v17  ;;  %4351 = vmatprep.mubr.msk.bf16.mxu1 %vm5066_vm0, %v5065_v17 }
 0xa3b   : > { %4355 = vmatprep.subr.bf16.mxu1 %v5065_v17  ;;  %3350 = vmatprep.subr.bf16.mxu0 %v4852_v13 }
 0xa40   : > { %4346 = vmatmul.mubr.msk.bf16.vlgmr.msra.gmra.mxu0 %vm2034_vm1, %v3150_v16  ;;  %v3428_v16 = vpop.permute.xlu1 %3427 }
 0xa41   : > { %3374 = vmatprep.mubr.bf16.mxu0 %v5064_v0  ;;  %3351 = vmatpush1.bf16.msra.mxu0 %v4850_v12 }
 0xa42   : > { %3352 = vmatprep.subr.bf16.mxu0 %v4856_v22 }
 0xa44   : > { %v3491_v28 = vpop.permute.xlu1 %3490 }
 0xa45   : > { %3353 = vmatpush1.bf16.msra.mxu0 %v4854_v31  ;;  %v3496_v36 = vsel %vm2096_vm2, %v3491_v28, 0 }
 0xa46   : > { %3354 = vmatprep.subr.bf16.mxu0 %v4860_v20 }
 0xa49   : > { %3355 = vmatpush1.bf16.msra.mxu0 %v4858_v25 }
 0xa4a   : > { %3356 = vmatprep.subr.bf16.mxu0 %v4864_v35 }
 0xa4d   : > { %3357 = vmatpush1.bf16.msra.mxu0 %v4862_v23 }
 0xa4e   : > { %4367 = vmatprep.subr.bf16.mxu0 %v5065_v17 }
 0xaf8   : > { %v3100_v5 = vpop.f32.mrf.mxu0  ;;  %v3141_v53 = vpop.f32.mrf.mxu1 }
 0xaf9   : > { %v5439_v54 = vadd.f32 %v3100_v5, %v5399_v2  ;;  %v5442_v55 = vadd.f32 %v3141_v53, %v5402_v4 }
 0xafa   : > { %v3102_v56 = vpop.f32.mrf.mxu0  ;;  %v4341_v57 = vpop.f32.mrf.mxu1 }
 0xafb   : > { %v5445_v58 = vadd.f32 %v3102_v56, %v5405_v9 }
 0xafc   : > { %v3104_v59 = vpop.f32.mrf.mxu0  ;;  %v3144_v60 = vpop.f32.mrf.mxu1 }
 0xafe   : > { %v3105_v61 = vpop.f32.mrf.mxu0  ;;  %v4342_v62 = vpop.f32.mrf.mxu1 }
 0xaff   : > { %v4868_v61 = vld [vmem:[#allocation7 + $0x22c] ss:$12 sps:$4 sm:$0xff]   ;;  %v4869_v62 = vld [vmem:[#allocation7 + $0x230] ss:$12 sps:$4 sm:$0xff]  }
 0xb00   : > { %v3193_v3 = vpop.f32.mrf.mxu0 }
 0xb01   : > { %v3199_v15 = vsel %vm5291_vm3, %v3193_v3, -1e+30  ;;  %v4872_v3 = vld [vmem:[#allocation7 + $0x214] ss:$12 sps:$4 sm:$0xff]  }
 0xb02   : > { %v4347_v63 = vpop.f32.mrf.mxu0  ;;  %v3200_v1 = vsel %vm2082_vm4, %v3199_v15, -inf }
 0xb03   : > { %3201 = vmax.xlane.f32.xlu0 %v3200_v1  ;;  %v4870_v63 = vld [vmem:[#allocation7 + $0x210] ss:$12 sps:$4 sm:$0xff]  }
 0xb04   : > { %v3196_v2 = vpop.f32.mrf.mxu0  ;;  %v4876_v1 = vld [vmem:[#allocation7 + $0x1fc] ss:$12 sps:$4 sm:$0xff]  }
 0xb05   : > { %v4877_v2 = vld [vmem:[#allocation7 + $0x200] ss:$12 sps:$4 sm:$0xff]  }
 0xb06   : > { %v4348_v4 = vpop.f32.mrf.mxu0 }
 0xb07   : > { %v4874_v4 = vld [vmem:[#allocation7 + $0x1f8] ss:$12 sps:$4 sm:$0xff]  }
 0xb8c   : > { %v3202_v6 = vpop.xlane.xlu0 %3201 }
 0xb8d   : > { %v3203_v8 = vsub.f32 %v3199_v15, %v3202_v6  ;;  %v4873_v15 = vld [vmem:[#allocation7 + $0x218] ss:$12 sps:$4 sm:$0xff]  }
 0xb8e   : > { %v4880_v6 = vld [vmem:[#allocation7 + $0x1e4] ss:$12 sps:$4 sm:$0xff]  }
 0xb8f   : > { %v3204_v10 = vmul.f32 1.442695, %v3203_v8  ;;  %v4878_v8 = vld [vmem:[#allocation7 + $0x1e0] ss:$12 sps:$4 sm:$0xff]  }
 0xb91   : > { %4898 = vpow2.f32 %v3204_v10  ;;  %v4881_v10 = vld [vmem:[#allocation7 + $0x1e8] ss:$12 sps:$4 sm:$0xff]  }
 0xb9e   : > { %v4899_v9 = vpop.eup %4898 }
 0xb9f   : > { %v3206_v44 = vsel %vm2082_vm4, %v4899_v9, 0.0  ;;  %v3209_v11 = vpack.c.bf16 %v4899_v9, %v4899_v9 }
 0xba0   : > { %3207 = vadd.xlane.f32.xlu0 %v3206_v44 }
 0xba1   : > { %4352 = vmatmul.mubr.msk.bf16.vlgmr.msra.gmra.mxu1 %vm2082_vm4, %v3209_v11 }
 0xba2   : > { %4363 = vmatprep.mubr.msk.bf16.mxu1 %vm5066_vm0, %v5065_v17  ;;  %4356 = vmatpush3.bf16.msra.mxu1 %v4853_v21 }
 0xba3   : > { %4357 = vmatprep.subr.bf16.mxu1 %v5065_v17 }
 0xba6   : > { %4358 = vmatpush3.bf16.msra.mxu1 %v4857_v19 }
 0xba7   : > { %4359 = vmatprep.subr.bf16.mxu1 %v5065_v17 }
 0xbaa   : > { %4360 = vmatpush3.bf16.msra.mxu1 %v4861_v24 }
 0xbab   : > { %4361 = vmatprep.subr.bf16.mxu1 %v5065_v17 }
 0xbae   : > { %4362 = vmatpush3.bf16.msra.mxu1 %v4865_v26 }
 0xbaf   : > { %4373 = vmatprep.subr.bf16.mxu1 %v5065_v17 }
 0xbb6   : > { %3430 = vrot.lane.b32.xlu0 %v3151_v43, %s5067_s21 }
 0xc29   : > { %v3208_v14 = vpop.xlane.xlu0 %3207 }
 0xc2a   : > { %4900 = vrcp.f32 %v3208_v14 }
 0xc2d   : > { %v3431_v30 = vpop.permute.xlu0 %3430 }
 0xc2e   : > { %v3436_v37 = vsel %vm2034_vm1, %v3431_v30, 0 }
 0xc37   : > { %v4901_v52 = vpop.eup %4900 }
 0xc61   : > { %v3250_v18 = vpop.f32.mrf.mxu1 }
 0xc62   : > { %v3257_v29 = vmul.f32 %v4901_v52, %v3250_v18 }
 0xc63   : > { %v4353_v32 = vpop.f32.mrf.mxu1 }
 0xc64   : > { %v3258_v34 = vpack.c.bf16 %v3257_v29, %v3257_v29 }
 0xc65   : > { %v3253_v49 = vpop.f32.mrf.mxu1 }
 0xc66   : > { %4121 = vmatmul.mubr.msk.bf16.vlgmr.msra.gmra.mxu0 %vm2034_vm1, %v3258_v34  ;;  %4364 = vmatmul.mubr.msk.bf16.vlgmr.msra.gmra.mxu1 %vm2034_vm1, %v3258_v34 }
 0xc67   : > { %4368 = vmatpush3.bf16.xpose.msra.mxu0 %v3436_v37  ;;  %4374 = vmatpush3.bf16.msra.mxu1 %v3496_v36  ;;  %v4354_v27 = vpop.f32.mrf.mxu1 }
 0xc68   : > { %4369 = vmatprep.mubr.msk.bf16.mxu0 %vm5066_vm0, %v5065_v17  ;;  %4375 = vmatprep.mubr.msk.bf16.mxu1 %vm5066_vm0, %v5065_v17 }
 0xc69   : > { %4379 = vmatprep.subr.bf16.mxu1 %v5065_v17  ;;  %3632 = vmatprep.subr.bf16.mxu0 %v4868_v61 }
 0xc6e   : > { %4370 = vmatmul.mubr.msk.bf16.vlgmr.msra.gmra.mxu0 %vm2034_vm1, %v3428_v16 }
 0xc6f   : > { %3656 = vmatprep.mubr.bf16.mxu0 %v5064_v0  ;;  %3633 = vmatpush1.bf16.msra.mxu0 %v4866_v33 }
 0xc70   : > { %3634 = vmatprep.subr.bf16.mxu0 %v4872_v3 }
 0xc73   : > { %3635 = vmatpush1.bf16.msra.mxu0 %v4870_v63 }
 0xc74   : > { %3636 = vmatprep.subr.bf16.mxu0 %v4876_v1 }
 0xc77   : > { %3637 = vmatpush1.bf16.msra.mxu0 %v4874_v4 }
 0xc78   : > { %3638 = vmatprep.subr.bf16.mxu0 %v4880_v6 }
 0xc7b   : > { %3639 = vmatpush1.bf16.msra.mxu0 %v4878_v8 }
 0xd26   : > { %v3376_v38 = vpop.f32.mrf.mxu0  ;;  %v3417_v39 = vpop.f32.mrf.mxu1 }
 0xd27   : > { %v5472_v40 = vadd.f32 %v3376_v38, %v5439_v54  ;;  %v5475_v41 = vadd.f32 %v3417_v39, %v5442_v55 }
 0xd28   : > { %v3378_v42 = vpop.f32.mrf.mxu0  ;;  %v4365_v43 = vpop.f32.mrf.mxu1 }
 0xd29   : > { %v5478_v45 = vadd.f32 %v3378_v42, %v5445_v58 }
 0xd2a   : > { %v3380_v46 = vpop.f32.mrf.mxu0  ;;  %v3420_v47 = vpop.f32.mrf.mxu1 }
 0xd2c   : > { %v3381_v48 = vpop.f32.mrf.mxu0  ;;  %v4366_v7 = vpop.f32.mrf.mxu1 }
 0xd2e   : > { %v3472_v50 = vpop.f32.mrf.mxu0 }
 0xd2f   : > { %v3478_v0 = vsel %vm5291_vm3, %v3472_v50, -1e+30 }
 0xd30   : > { %v4371_v51 = vpop.f32.mrf.mxu0  ;;  %v3479_v5 = vsel %vm2082_vm4, %v3478_v0, -inf }
 0xd31   : > { %3480 = vmax.xlane.f32.xlu0 %v3479_v5 }
 0xd32   : > { %v3475_v53 = vpop.f32.mrf.mxu0 }
 0xd34   : > { %v4372_v54 = vpop.f32.mrf.mxu0 }
 0xdba   : > { %v3481_v55 = vpop.xlane.xlu0 %3480 }
 0xdbb   : > { %v3482_v56 = vsub.f32 %v3478_v0, %v3481_v55 }
 0xdbd   : > { %v3483_v57 = vmul.f32 1.442695, %v3482_v56 }
 0xdbf   : > { %4902 = vpow2.f32 %v3483_v57 }
 0xdcc   : > { %v4903_v58 = vpop.eup %4902 }
 0xdcd   : > { %v3485_v59 = vsel %vm2082_vm4, %v4903_v58, 0.0  ;;  %v3488_v60 = vpack.c.bf16 %v4903_v58, %v4903_v58 }
 0xdce   : > { %3486 = vadd.xlane.f32.xlu1 %v3485_v59 }
 0xdcf   : > { %4376 = vmatmul.mubr.msk.bf16.vlgmr.msra.gmra.mxu1 %vm2082_vm4, %v3488_v60 }
 0xdd0   : > { %4387 = vmatprep.mubr.msk.bf16.mxu1 %vm5066_vm0, %v5065_v17  ;;  %4380 = vmatpush3.bf16.msra.mxu1 %v4869_v62 }
 0xdd1   : > { %4381 = vmatprep.subr.bf16.mxu1 %v5065_v17 }
 0xdd4   : > { %4382 = vmatpush3.bf16.msra.mxu1 %v4873_v15 }
 0xdd5   : > { %4383 = vmatprep.subr.bf16.mxu1 %v5065_v17 }
 0xdd8   : > { %4384 = vmatpush3.bf16.msra.mxu1 %v4877_v2 }
 0xdd9   : > { %4385 = vmatprep.subr.bf16.mxu1 %v5065_v17 }
 0xddc   : > { %4386 = vmatpush3.bf16.msra.mxu1 %v4881_v10 }
 0xe57   : > { %v3487_v9 = vpop.xlane.xlu1 %3486 }
 0xe58   : > { %4904 = vrcp.f32 %v3487_v9 }
 0xe65   : > { %v4905_v44 = vpop.eup %4904 }
 0xe8f   : > { %v3532_v11 = vpop.f32.mrf.mxu1 }
 0xe90   : > { %v3539_v12 = vmul.f32 %v4905_v44, %v3532_v11 }
 0xe91   : > { %v4377_v13 = vpop.f32.mrf.mxu1 }
 0xe92   : > { %v3540_v21 = vpack.c.bf16 %v3539_v12, %v3539_v12 }
 0xe93   : > { %v3535_v22 = vpop.f32.mrf.mxu1 }
 0xe94   : > { %4137 = vmatmul.mubr.msk.bf16.vlgmr.msra.gmra.mxu0 %vm2034_vm1, %v3540_v21  ;;  %4388 = vmatmul.mubr.msk.bf16.vlgmr.msra.gmra.mxu1 %vm2034_vm1, %v3540_v21 }
 0xe95   : > { %v4378_v17 = vpop.f32.mrf.mxu1 }
 0xf54   : > { %v3658_v19 = vpop.f32.mrf.mxu0  ;;  %v3699_v31 = vpop.f32.mrf.mxu1 }
 0xf55   : > { %v3705_v20 = vadd.f32 %v3658_v19, %v5472_v40  ;;  %v3707_v24 = vadd.f32 %v3699_v31, %v5475_v41 }
 0xf56   : > { %v3660_v25 = vpop.f32.mrf.mxu0  ;;  %v4389_v35 = vpop.f32.mrf.mxu1 }
 0xf57   : > { %3708 = vst [vmem:[%s242_s9] sm:$0xff] %v3705_v20  ;;  %3710 = vst [vmem:[%s242_s9 + $0x10] sm:$0xff] %v3707_v24  ;;  %v3706_v23 = vadd.f32 %v3660_v25, %v5478_v45 }
 0xf58   : > { %v3662_v26 = vpop.f32.mrf.mxu0  ;;  %v3702_v14 = vpop.f32.mrf.mxu1 }
 0xf59   : > { %3709 = vst [vmem:[%s242_s9 + $0x8] sm:$0xff] %v3706_v23 }
 0xf5a   : > { %v3663_v16 = vpop.f32.mrf.mxu0  ;;  %v4390_v52 = vpop.f32.mrf.mxu1 }
 0xf5b   : > { %5000 = shalt.err (!%p4997_p9)
}
 0xf5c   : > { %s5001_s11 = scalar_lea.hbm %s5500_s19, 384  ;;  %s5005_s21 = scalar_lea.hbm %s5547_s4, 768 }
 0xf5d   : > { %p5002_p13 = scmp.ne.s32.totalorder %s5500_s19, %s5001_s11  ;;  %p5006_p0 = scmp.lt.s32.totalorder %s5500_s19, %s5547_s4 }
 0xf5e   : > { %p5007_p4 = scmp.lt.s32.totalorder %s5005_s21, %s5001_s11 }
 0xf5f   : > { %p5003_p5 = pnand %p5002_p13, %p5565_p11 }
 0xf60   : > { %p5008_p8 = por %p5007_p4, %p5006_p0 }
 0xf61   : > { %p5004_p10 = pneg %p5003_p5 }
 0xf63   : > { %p5009_p7 = pnand %p5008_p8, %p5004_p10 }
 0xf65   : > { %5012 = shalt.err (!%p5009_p7)
}
 0xf66   : > { %4406 = dma.vmem_to_hbm [thread:$0]  (%p5565_p11), %s5502_s14, 384, %s5500_s19, %s3712_s27  }
 0xf67 PF: > { %s3738_s6 = sand.u32 1, %s5043_s15   ;;  %p5566_p1 = scmp.ne.s32.totalorder %s5553_s22, 0 }
 0xf68   : > { %p5567_p2 = scmp.ge.s32.totalorder %s5055_s18, 2  ;;  %s3739_s8 = scalar_lea.sflag [#allocation4], %s3738_s6 }
 0xf6a   : > { %p4420_p6 = pnand %p5567_p2, %p5566_p1 }
 0xf6c   : > { %p4421_p12 = pneg %p4420_p6 }
 0xf6e   : > { %5038 = dma.done.wait (%p4421_p12), %s3739_s8, 384  }
 0xf6f   : > { %5040 = vsyncadd (%p4421_p12), %s3739_s8, 4294966912  ;;  %p18_p3 = scmp.ge.s32.totalorder %s5166_s13, 4   ;;  %s5568_s15 = smov %s5047_s16 }
 0xf70   : > { %s5569_s16 = smov %s5051_s17  ;;  %s5570_s17 = smov %s5175_s24 }
 0xf71   : > { %s5571_s18 = smov %s5166_s13  ;;  %20 = sbr.rel (!%p18_p3) target bundleno = 6 (0x6), region = 89 }
 0xf76   :  { %3744 = vsyncpa [#allocation3], 1 }
 0xf77   :  { %3746 = vsyncpa [#allocation3 + $0x1], 1 }
 0xf78   :  { %3747 = vsyncpa [#allocation6], 1 }
 0xf79   :  { %3748 = vsyncpa [#allocation4], 1 }
 0xf7a   :  { %3750 = vsyncpa [#allocation4 + $0x1], 1 }

</bundles_post_ra>
